<compile_context>
chip_gen: v7x
topology: tpu7x:2x2x1
jax: 0.10.0
libtpu: 0.0.40
codegen_flags: <defaults>
</compile_context>

<pallas_src>
import functools

import jax
import jax.numpy as jnp
import numpy as np
from jax.experimental import pallas as pl
from jax.experimental.pallas import tpu as pltpu


def _round_up(x, m):
    return (x + m - 1) // m * m


def _bytes(shape, dtype):
    return int(np.prod(shape)) * jnp.dtype(dtype).itemsize


def _choose_seq_tiling(S):
    """Sequence tile (multiple of 16 for bf16 sublane packing) and padded length."""
    tile_s = min(256, _round_up(S, 16))
    return tile_s, _round_up(S, tile_s)


def _choose_vocab_tiling(V):
    """Vocab tile width (lane multiple) and tile count; >=2 even tiles for v7x megacore."""
    if V <= 256:
        tile = _round_up(V, 128)          # tiny vocab: single tile
        return tile, 1
    n = max(2, -(-V // 2048))             # aim for <=2048-wide tiles
    if n % 2:
        n += 1                            # even tile count shards across both v7x TCs
    tile = _round_up(-(-V // n), 256)
    return tile, n


# --------------------------------------------------------------------------------------
# Kernel 1: GRU cell + online-softmax dot attention + context + concat projection.
# Grid: (num_s_tiles,), sequence axis "arbitrary" (accumulator).
# --------------------------------------------------------------------------------------
def gru_attn_concat_kernel(x_ref, h_ref, enc_ref,
                           wi_ref, wh_ref, bi_ref, bh_ref,
                           wc1_ref, wc2_ref, bc_ref,
                           hnew_ref, concat_ref,
                           h_sc, ctx_sc, m_sc, l_sc,
                           *, hp, tile_s, seq_len):
    f32 = jnp.float32
    bf16 = jnp.bfloat16
    s_idx = pl.program_id(0)

    # ---- GRU cell + accumulator init: only on the first sequence tile ----
    @pl.when(s_idx == 0)
    def _():
        x = x_ref[...]                       # (Bp, Hp) f32 embedded input step
        h = h_ref[...]                       # (Bp, Hp) f32 previous hidden (layer 0)
        gi = jnp.dot(x.astype(bf16), wi_ref[...], preferred_element_type=f32) + bi_ref[...]
        gh = jnp.dot(h.astype(bf16), wh_ref[...], preferred_element_type=f32) + bh_ref[...]
        r = jax.nn.sigmoid(gi[:, 0:hp] + gh[:, 0:hp])
        z = jax.nn.sigmoid(gi[:, hp:2 * hp] + gh[:, hp:2 * hp])
        n = jnp.tanh(gi[:, 2 * hp:3 * hp] + r * gh[:, 2 * hp:3 * hp])
        h_sc[...] = (1.0 - z) * n + z * h    # rnn_output == new hidden
        ctx_sc[...] = jnp.zeros_like(ctx_sc)
        m_sc[...] = jnp.full_like(m_sc, -1e30)
        l_sc[...] = jnp.zeros_like(l_sc)

    h_new = h_sc[...]                                               # (Bp, Hp) f32

    # ---- dot attention on this sequence tile (VPU + reduce), online softmax ----
    enc = enc_ref[...].astype(f32)                                  # (Bp, ts, Hp) bf16 -> f32
    energies = jnp.sum(h_new[:, None, :] * enc, axis=-1)            # (Bp, ts)
    pos = s_idx * tile_s + jax.lax.broadcasted_iota(jnp.int32, energies.shape, 1)
    energies = jnp.where(pos < seq_len, energies, -1e30)            # mask padded positions

    m_prev = m_sc[...]
    m_new = jnp.maximum(m_prev, jnp.max(energies, axis=1, keepdims=True))
    alpha = jnp.exp(m_prev - m_new)
    p = jnp.exp(energies - m_new)                                   # masked -> exactly 0
    l_sc[...] = alpha * l_sc[...] + jnp.sum(p, axis=1, keepdims=True)
    ctx_sc[...] = alpha * ctx_sc[...] + jnp.sum(p[:, :, None] * enc, axis=1)
    m_sc[...] = m_new

    # ---- finalize: normalize context, concat Linear(2H->H) as two HxH matmuls ----
    @pl.when(s_idx == pl.num_programs(0) - 1)
    def _():
        context = ctx_sc[...] / l_sc[...]                           # exact divide
        concat_out = jnp.tanh(
            jnp.dot(h_new.astype(bf16), wc1_ref[...], preferred_element_type=f32)
            + jnp.dot(context.astype(bf16), wc2_ref[...], preferred_element_type=f32)
            + bc_ref[...])
        hnew_ref[...] = h_new.astype(hnew_ref.dtype)
        concat_ref[...] = concat_out.astype(concat_ref.dtype)


# --------------------------------------------------------------------------------------
# Kernel 2: output projection, vocab-tiled (the dominant matmul / dominant bytes).
# --------------------------------------------------------------------------------------
def out_proj_kernel(c_ref, w_ref, b_ref, o_ref):
    o_ref[...] = (jnp.dot(c_ref[...].astype(jnp.bfloat16), w_ref[0],
                          preferred_element_type=jnp.float32)
                  + b_ref[...]).astype(o_ref.dtype)


# --------------------------------------------------------------------------------------
# Parameters & one-time prep (hoisted out of the per-token decode step).
# --------------------------------------------------------------------------------------
def init_params(key, num_words, hidden_size):
    ks = jax.random.split(key, 10)
    s = 0.1
    return {
        # nn.Embedding(num_words, hidden_size)
        "embedding": jax.random.normal(ks[0], (num_words, hidden_size), jnp.float32) * s,
        # nn.GRU(hidden, hidden, 1): weight_ih_l0 (3H,H), weight_hh_l0 (3H,H), biases (3H,)
        "W_ih": jax.random.normal(ks[1], (3 * hidden_size, hidden_size), jnp.float32) * s,
        "W_hh": jax.random.normal(ks[2], (3 * hidden_size, hidden_size), jnp.float32) * s,
        "b_ih": jax.random.normal(ks[3], (3 * hidden_size,), jnp.float32) * s,
        "b_hh": jax.random.normal(ks[4], (3 * hidden_size,), jnp.float32) * s,
        # nn.Linear(2H, H)
        "W_concat": jax.random.normal(ks[5], (hidden_size, 2 * hidden_size), jnp.float32) * s,
        "b_concat": jax.random.normal(ks[6], (hidden_size,), jnp.float32) * s,
        # nn.Linear(H, output_size=num_words)
        "W_out": jax.random.normal(ks[7], (num_words, hidden_size), jnp.float32) * s,
        "b_out": jax.random.normal(ks[8], (num_words,), jnp.float32) * s,
    }


def prepare_params(params):
    """One-time weight prep: split / transpose / pad / cast (NOT per decode step)."""
    H = params["W_concat"].shape[0]
    V = params["W_out"].shape[0]
    Hp = _round_up(H, 128)
    tile_v, n_v = _choose_vocab_tiling(V)
    Vp = tile_v * n_v

    def pad2(a, r, c):
        return jnp.pad(a, ((0, r - a.shape[0]), (0, c - a.shape[1])))

    def gate_w(W):      # (3H, H) -> (Hp, 3Hp) bf16, transposed to (in, out), gate-blocked
        return jnp.concatenate(
            [pad2(W[g * H:(g + 1) * H].T, Hp, Hp) for g in range(3)], axis=1
        ).astype(jnp.bfloat16)

    def gate_b(b):      # (3H,) -> (1, 3Hp) f32, gate-blocked with zero pad
        return jnp.concatenate(
            [jnp.pad(b[g * H:(g + 1) * H], (0, Hp - H)) for g in range(3)])[None, :]

    Wc = params["W_concat"]                                            # (H, 2H)
    # W_out: (V, H) -> (Hp, Vp) -> tile-major (n_v, Hp, tile_v): one contiguous DMA per tile.
    w_out = pad2(params["W_out"].T, Hp, Vp).astype(jnp.bfloat16)
    w_out = w_out.reshape(Hp, n_v, tile_v).transpose(1, 0, 2)
    return {
        "embedding": jnp.pad(params["embedding"], ((0, 0), (0, Hp - H))),
        "W_i": gate_w(params["W_ih"]),
        "W_h": gate_w(params["W_hh"]),
        "b_i": gate_b(params["b_ih"]),
        "b_h": gate_b(params["b_hh"]),
        "W_c1": pad2(Wc[:, :H].T, Hp, Hp).astype(jnp.bfloat16),        # rnn_output half
        "W_c2": pad2(Wc[:, H:].T, Hp, Hp).astype(jnp.bfloat16),        # context half
        "b_c": jnp.pad(params["b_concat"], (0, Hp - H))[None, :],
        "W_out": w_out,                                                # (n_v, Hp, tile_v) bf16
        "b_out": jnp.pad(params["b_out"], (0, Vp - V))[None, :],
    }


def prepare_encoder_outputs(encoder_outputs, batch_pad, hidden_pad):
    """Per-sequence prep: (S,B,H) time-major -> batch-major zero-padded bf16 (Bp, Sp, Hp)."""
    S, B, H = encoder_outputs.shape
    _, Sp = _choose_seq_tiling(S)
    enc = jnp.transpose(encoder_outputs, (1, 0, 2))
    enc = jnp.pad(enc, ((0, batch_pad - B), (0, Sp - S), (0, hidden_pad - H)))
    return enc.astype(jnp.bfloat16)


# --------------------------------------------------------------------------------------
# Forward (single decode step).
# --------------------------------------------------------------------------------------
@functools.partial(jax.jit, static_argnames=("output_size", "seq_len"))
def luong_attn_decoder_forward(input_step, last_hidden, enc_prep, prep, *,
                               output_size, seq_len):
    """input_step: (1,B) int32; last_hidden: (1,B,H) f32; enc_prep: (Bp,Sp,Hp) bf16."""
    B = input_step.shape[1]
    H = last_hidden.shape[-1]
    Bp, Sp, Hp = enc_prep.shape
    num_v_tiles, _, tile_v = prep["W_out"].shape
    Vp = num_v_tiles * tile_v
    V = output_size
    tile_s, _ = _choose_seq_tiling(seq_len)
    num_s_tiles = Sp // tile_s

    # ---- glue: embedding gather (+ embedding_dropout == identity in eval), pad B/H ----
    embedded = prep["embedding"][input_step[0]]                        # (B, Hp)
    embedded = jnp.pad(embedded, ((0, Bp - B), (0, 0)))                # (Bp, Hp)
    h_prev = jnp.pad(last_hidden[0], ((0, Bp - B), (0, Hp - H)))       # (Bp, Hp)

    # ---- kernel 1: GRU + online-softmax attention + concat projection (seq-tiled) ----
    resident1 = (
        2 * _bytes((Bp, Hp), jnp.float32)              # x, h
        + 2 * _bytes((Hp, 3 * Hp), jnp.bfloat16)       # W_i, W_h
        + 2 * _bytes((1, 3 * Hp), jnp.float32)         # b_i, b_h
        + 2 * _bytes((Hp, Hp), jnp.bfloat16)           # W_c1, W_c2
        + _bytes((1, Hp), jnp.float32)                 # b_c
        + 2 * _bytes((Bp, Hp), jnp.float32)            # outputs (h_new, concat)
        + 2 * _bytes((Bp, Hp), jnp.float32)            # scratch h_sc, ctx_sc
        + 2 * _bytes((Bp, 1), jnp.float32))            # scratch m_sc, l_sc
    streamed1 = 2 * _bytes((Bp, tile_s, Hp), jnp.bfloat16)     # double-buffered enc tile
    interm1 = 3 * _bytes((Bp, tile_s, Hp), jnp.float32)        # f32 upcast / broadcast temps
    vmem1 = min(resident1 + streamed1 + interm1 + (8 << 20), 48 << 20)

    res_spec = pl.BlockSpec((Bp, Hp), lambda s: (0, 0))
    h_new, concat_out = pl.pallas_call(
        functools.partial(gru_attn_concat_kernel, hp=Hp, tile_s=tile_s, seq_len=seq_len),
        out_shape=(jax.ShapeDtypeStruct((Bp, Hp), jnp.float32),
                   jax.ShapeDtypeStruct((Bp, Hp), jnp.float32)),
        grid=(num_s_tiles,),
        in_specs=[res_spec,                                              # embedded
                  res_spec,                                              # h_prev
                  pl.BlockSpec((Bp, tile_s, Hp), lambda s: (0, s, 0)),   # enc (streamed)
                  pl.BlockSpec((Hp, 3 * Hp), lambda s: (0, 0)),          # W_i
                  pl.BlockSpec((Hp, 3 * Hp), lambda s: (0, 0)),          # W_h
                  pl.BlockSpec((1, 3 * Hp), lambda s: (0, 0)),           # b_i
                  pl.BlockSpec((1, 3 * Hp), lambda s: (0, 0)),           # b_h
                  pl.BlockSpec((Hp, Hp), lambda s: (0, 0)),              # W_c1
                  pl.BlockSpec((Hp, Hp), lambda s: (0, 0)),              # W_c2
                  pl.BlockSpec((1, Hp), lambda s: (0, 0))],              # b_c
        out_specs=(res_spec, res_spec),
        scratch_shapes=[pltpu.VMEM((Bp, Hp), jnp.float32),   # h_sc
                        pltpu.VMEM((Bp, Hp), jnp.float32),   # ctx_sc
                        pltpu.VMEM((Bp, 1), jnp.float32),    # m_sc
                        pltpu.VMEM((Bp, 1), jnp.float32)],   # l_sc
        compiler_params=pltpu.CompilerParams(
            dimension_semantics=("arbitrary",), vmem_limit_bytes=vmem1),
    )(embedded, h_prev, enc_prep,
      prep["W_i"], prep["W_h"], prep["b_i"], prep["b_h"],
      prep["W_c1"], prep["W_c2"], prep["b_c"])

    # ---- kernel 2: vocab-tiled output projection (pipelined; parallel -> v7x megacore) ----
    nbuf = 3 if num_v_tiles >= 3 else 2
    vmem2 = min(
        _bytes((Bp, Hp), jnp.float32)
        + nbuf * _bytes((Hp, tile_v), jnp.bfloat16)
        + 2 * _bytes((1, tile_v), jnp.float32)
        + 2 * _bytes((Bp, tile_v), jnp.float32)
        + (6 << 20),
        48 << 20)
    if num_v_tiles >= 3:
        w_spec = pl.BlockSpec((1, Hp, tile_v), lambda j: (j, 0, 0),
                              pipeline_mode=pl.Buffered(3))
    else:
        w_spec = pl.BlockSpec((1, Hp, tile_v), lambda j: (j, 0, 0))
    logits = pl.pallas_call(
        out_proj_kernel,
        out_shape=jax.ShapeDtypeStruct((Bp, Vp), jnp.float32),
        grid=(num_v_tiles,),
        in_specs=[pl.BlockSpec((Bp, Hp), lambda j: (0, 0)),
                  w_spec,
                  pl.BlockSpec((1, tile_v), lambda j: (0, j))],
        out_specs=pl.BlockSpec((Bp, tile_v), lambda j: (0, j)),
        compiler_params=pltpu.CompilerParams(
            dimension_semantics=("parallel",), vmem_limit_bytes=vmem2),
    )(concat_out, prep["W_out"], prep["b_out"])

    # ---- softmax over the (small) logits in XLA; strip batch/hidden/vocab padding ----
    output = jax.nn.softmax(logits[:B, :V], axis=1)                    # (B, V)
    hidden = h_new[:B, :H][None]                                       # (1, B, H)
    return output, hidden


# --------------------------------------------------------------------------------------
# Pure-JAX reference mirroring the PyTorch module (for the correctness check).
# --------------------------------------------------------------------------------------
def reference_forward(input_step, last_hidden, encoder_outputs, params):
    H = last_hidden.shape[-1]
    x = params["embedding"][input_step[0]]                   # (B, H)
    h = last_hidden[0]                                       # (B, H)
    gi = x @ params["W_ih"].T + params["b_ih"]
    gh = h @ params["W_hh"].T + params["b_hh"]
    r = jax.nn.sigmoid(gi[:, :H] + gh[:, :H])
    z = jax.nn.sigmoid(gi[:, H:2 * H] + gh[:, H:2 * H])
    n = jnp.tanh(gi[:, 2 * H:] + r * gh[:, 2 * H:])
    h_new = (1 - z) * n + z * h                              # rnn_output (B, H)

    energies = jnp.sum(h_new[None, :, :] * encoder_outputs, axis=2)   # (S, B)
    attn_w = jax.nn.softmax(energies.T, axis=1)                       # (B, S)
    context = jnp.einsum('bs,sbd->bd', attn_w, encoder_outputs)       # (B, H)

    concat_in = jnp.concatenate([h_new, context], axis=1)
    concat_out = jnp.tanh(concat_in @ params["W_concat"].T + params["b_concat"])
    logits = concat_out @ params["W_out"].T + params["b_out"]
    return jax.nn.softmax(logits, axis=1), h_new[None]


if __name__ == "__main__":
    def run_case(key, batch, hidden_size, seq_len, num_words):
        kp, k1, k2, k3 = jax.random.split(key, 4)
        params = init_params(kp, num_words, hidden_size)
        input_step = jax.random.randint(k1, (1, batch), 0, num_words, dtype=jnp.int32)
        last_hidden = jax.random.normal(k2, (1, batch, hidden_size), jnp.float32)
        encoder_outputs = jax.random.normal(k3, (seq_len, batch, hidden_size), jnp.float32)

        # One-time preps (hoisted out of the per-token decode step).
        prep = prepare_params(params)
        Hp = prep["W_c1"].shape[0]
        Bp = _round_up(batch, 8)
        enc_prep = prepare_encoder_outputs(encoder_outputs, Bp, Hp)

        out, hidden = luong_attn_decoder_forward(
            input_step, last_hidden, enc_prep, prep,
            output_size=num_words, seq_len=seq_len)
        jax.block_until_ready((out, hidden))

        ref_out, ref_hidden = reference_forward(input_step, last_hidden,
                                                encoder_outputs, params)
        # bf16 matmul operands / bf16 encoder stream -> slightly loosened tolerance.
        np.testing.assert_allclose(np.asarray(out), np.asarray(ref_out),
                                   rtol=2e-2, atol=2e-2)
        np.testing.assert_allclose(np.asarray(hidden), np.asarray(ref_hidden),
                                   rtol=2e-2, atol=2e-2)
        assert out.shape == (batch, num_words)
        assert hidden.shape == (1, batch, hidden_size)

    key = jax.random.PRNGKey(0)
    kA, kB = jax.random.split(key)
    # Small shapes consistent with the module's forward (single grid point per kernel).
    run_case(kA, batch=2, hidden_size=32, seq_len=8, num_words=40)
    # Second case exercising seq-tile online softmax (+ masking) and multi-vocab-tile grid.
    run_case(kB, batch=3, hidden_size=160, seq_len=300, num_words=600)

    print("KERNEL_OK")
</pallas_src>

<mosaic_0001>
module attributes {stable_mosaic.version = 11 : i64} {
  func.func @out_proj_kernel(%arg0: i32, %arg1: memref<8x128xf32, #tpu.memory_space<vmem>>, %arg2: memref<1x128x128xbf16, #tpu.memory_space<vmem>>, %arg3: memref<1x128xf32, #tpu.memory_space<vmem>>, %arg4: memref<8x128xf32, #tpu.memory_space<vmem>>) attributes {dimension_semantics = [#tpu.dimension_semantics<parallel>], iteration_bounds = array<i64: 1>, scalar_prefetch = 0 : i64, scratch_operands = 0 : i64, tpu.core_type = #tpu.core_type<tc>, window_params = [{pipeline_mode = #tpu.pipeline_mode<synchronous>, transform_indices = @transform_0, window_bounds = array<i64: 8, 128>}, {transform_indices = @transform_1, window_bounds = array<i64: 1, 128, 128>}, {transform_indices = @transform_2, window_bounds = array<i64: 1, 128>}, {transform_indices = @transform_3, window_bounds = array<i64: 8, 128>}]} {
    %c0 = arith.constant 0 : index
    %c0_0 = arith.constant 0 : index
    %0 = vector.load %arg1[%c0, %c0_0] : memref<8x128xf32, #tpu.memory_space<vmem>>, vector<8x128xf32>
    %1 = arith.truncf %0 : vector<8x128xf32> to vector<8x128xbf16>
    %c0_1 = arith.constant 0 : index
    %c0_2 = arith.constant 0 : index
    %c0_3 = arith.constant 0 : index
    %2 = vector.load %arg2[%c0_1, %c0_2, %c0_3] : memref<1x128x128xbf16, #tpu.memory_space<vmem>>, vector<1x128x128xbf16>
    %3 = vector.shape_cast %2 : vector<1x128x128xbf16> to vector<128x128xbf16>
    %cst = arith.constant dense<0.000000e+00> : vector<8x128xf32>
    %4 = tpu.matmul %1, %3, %cst {dimension_numbers = #tpu.dot_dimension_numbers<[1], [0], [0], [1], [0, 0, 1, 1], [], []>} : vector<8x128xbf16>, vector<128x128xbf16>, vector<8x128xf32> -> vector<8x128xf32>
    %c0_4 = arith.constant 0 : index
    %c0_5 = arith.constant 0 : index
    %5 = vector.load %arg3[%c0_4, %c0_5] : memref<1x128xf32, #tpu.memory_space<vmem>>, vector<1x128xf32>
    %6 = vector.broadcast %5 : vector<1x128xf32> to vector<8x128xf32>
    %7 = arith.addf %4, %6 : vector<8x128xf32>
    %c0_6 = arith.constant 0 : index
    %c0_7 = arith.constant 0 : index
    %8 = vector.load %arg4[%c0_6, %c0_7] : memref<8x128xf32, #tpu.memory_space<vmem>>, vector<8x128xf32>
    tpu.vector_store %arg4[%c0_6, %c0_7], %7 {strides = array<i32>} : memref<8x128xf32, #tpu.memory_space<vmem>>, vector<8x128xf32>,
    return
  }
  func.func @transform_0(%arg0: i32) -> (i32, i32) {
    %c0_i32 = arith.constant 0 : i32
    %c0_i32_0 = arith.constant 0 : i32
    %c0_i32_1 = arith.constant 0 : i32
    return %c0_i32, %c0_i32_0 : i32, i32
  }
  func.func @transform_1(%arg0: i32) -> (i32, i32, i32) {
    %c0_i32 = arith.constant 0 : i32
    %c0_i32_0 = arith.constant 0 : i32
    %c0_i32_1 = arith.constant 0 : i32
    return %arg0, %c0_i32, %c0_i32_0 : i32, i32, i32
  }
  func.func @transform_2(%arg0: i32) -> (i32, i32) {
    %c0_i32 = arith.constant 0 : i32
    %c0_i32_0 = arith.constant 0 : i32
    return %c0_i32, %arg0 : i32, i32
  }
  func.func @transform_3(%arg0: i32) -> (i32, i32) {
    %c0_i32 = arith.constant 0 : i32
    %c0_i32_0 = arith.constant 0 : i32
    return %c0_i32, %arg0 : i32, i32
  }
}

module attributes {stable_mosaic.version = 11 : i64} {
  func.func @gru_attn_concat_kernel(%arg0: i32, %arg1: memref<8x128xf32, #tpu.memory_space<vmem>>, %arg2: memref<8x128xf32, #tpu.memory_space<vmem>>, %arg3: memref<8x16x128xbf16, #tpu.memory_space<vmem>>, %arg4: memref<128x384xbf16, #tpu.memory_space<vmem>>, %arg5: memref<128x384xbf16, #tpu.memory_space<vmem>>, %arg6: memref<1x384xf32, #tpu.memory_space<vmem>>, %arg7: memref<1x384xf32, #tpu.memory_space<vmem>>, %arg8: memref<128x128xbf16, #tpu.memory_space<vmem>>, %arg9: memref<128x128xbf16, #tpu.memory_space<vmem>>, %arg10: memref<1x128xf32, #tpu.memory_space<vmem>>, %arg11: memref<8x128xf32, #tpu.memory_space<vmem>>, %arg12: memref<8x128xf32, #tpu.memory_space<vmem>>, %arg13: memref<8x128xf32, #tpu.memory_space<vmem>>, %arg14: memref<8x128xf32, #tpu.memory_space<vmem>>, %arg15: memref<8x1xf32, #tpu.memory_space<vmem>>, %arg16: memref<8x1xf32, #tpu.memory_space<vmem>>) attributes {dimension_semantics = [#tpu.dimension_semantics<arbitrary>], iteration_bounds = array<i64: 1>, scalar_prefetch = 0 : i64, scratch_operands = 4 : i64, tpu.core_type = #tpu.core_type<tc>, window_params = [{pipeline_mode = #tpu.pipeline_mode<synchronous>, transform_indices = @transform_0, window_bounds = array<i64: 8, 128>}, {pipeline_mode = #tpu.pipeline_mode<synchronous>, transform_indices = @transform_1, window_bounds = array<i64: 8, 128>}, {transform_indices = @transform_2, window_bounds = array<i64: 8, 16, 128>}, {pipeline_mode = #tpu.pipeline_mode<synchronous>, transform_indices = @transform_3, window_bounds = array<i64: 128, 384>}, {pipeline_mode = #tpu.pipeline_mode<synchronous>, transform_indices = @transform_4, window_bounds = array<i64: 128, 384>}, {pipeline_mode = #tpu.pipeline_mode<synchronous>, transform_indices = @transform_5, window_bounds = array<i64: 1, 384>}, {pipeline_mode = #tpu.pipeline_mode<synchronous>, transform_indices = @transform_6, window_bounds = array<i64: 1, 384>}, {pipeline_mode = #tpu.pipeline_mode<synchronous>, transform_indices = @transform_7, window_bounds = array<i64: 128, 128>}, {pipeline_mode = #tpu.pipeline_mode<synchronous>, transform_indices = @transform_8, window_bounds = array<i64: 128, 128>}, {pipeline_mode = #tpu.pipeline_mode<synchronous>, transform_indices = @transform_9, window_bounds = array<i64: 1, 128>}, {pipeline_mode = #tpu.pipeline_mode<synchronous>, transform_indices = @transform_10, window_bounds = array<i64: 8, 128>}, {pipeline_mode = #tpu.pipeline_mode<synchronous>, transform_indices = @transform_11, window_bounds = array<i64: 8, 128>}]} {
    %c0_i32 = arith.constant 0 : i32
    %0 = arith.cmpi eq, %arg0, %c0_i32 : i32
    %1 = arith.extui %0 : i1 to i32
    %c0_i32_0 = arith.constant 0 : i32
    %2 = arith.cmpi ne, %1, %c0_i32_0 : i32
    scf.if %2 {
      %c0_23 = arith.constant 0 : index
      %c0_24 = arith.constant 0 : index
      %46 = vector.load %arg1[%c0_23, %c0_24] : memref<8x128xf32, #tpu.memory_space<vmem>>, vector<8x128xf32>
      %c0_25 = arith.constant 0 : index
      %c0_26 = arith.constant 0 : index
      %47 = vector.load %arg2[%c0_25, %c0_26] : memref<8x128xf32, #tpu.memory_space<vmem>>, vector<8x128xf32>
      %48 = arith.truncf %46 : vector<8x128xf32> to vector<8x128xbf16>
      %c0_27 = arith.constant 0 : index
      %c0_28 = arith.constant 0 : index
      %49 = vector.load %arg4[%c0_27, %c0_28] : memref<128x384xbf16, #tpu.memory_space<vmem>>, vector<128x384xbf16>
      %cst_29 = arith.constant dense<0.000000e+00> : vector<8x384xf32>
      %50 = tpu.matmul %48, %49, %cst_29 {dimension_numbers = #tpu.dot_dimension_numbers<[1], [0], [0], [1], [0, 0, 1, 1], [], []>} : vector<8x128xbf16>, vector<128x384xbf16>, vector<8x384xf32> -> vector<8x384xf32>
      %c0_30 = arith.constant 0 : index
      %c0_31 = arith.constant 0 : index
      %51 = vector.load %arg6[%c0_30, %c0_31] : memref<1x384xf32, #tpu.memory_space<vmem>>, vector<1x384xf32>
      %52 = vector.broadcast %51 : vector<1x384xf32> to vector<8x384xf32>
      %53 = arith.addf %50, %52 : vector<8x384xf32>
      %54 = arith.truncf %47 : vector<8x128xf32> to vector<8x128xbf16>
      %c0_32 = arith.constant 0 : index
      %c0_33 = arith.constant 0 : index
      %55 = vector.load %arg5[%c0_32, %c0_33] : memref<128x384xbf16, #tpu.memory_space<vmem>>, vector<128x384xbf16>
      %cst_34 = arith.constant dense<0.000000e+00> : vector<8x384xf32>
      %56 = tpu.matmul %54, %55, %cst_34 {dimension_numbers = #tpu.dot_dimension_numbers<[1], [0], [0], [1], [0, 0, 1, 1], [], []>} : vector<8x128xbf16>, vector<128x384xbf16>, vector<8x384xf32> -> vector<8x384xf32>
      %c0_35 = arith.constant 0 : index
      %c0_36 = arith.constant 0 : index
      %57 = vector.load %arg7[%c0_35, %c0_36] : memref<1x384xf32, #tpu.memory_space<vmem>>, vector<1x384xf32>
      %58 = vector.broadcast %57 : vector<1x384xf32> to vector<8x384xf32>
      %59 = arith.addf %56, %58 : vector<8x384xf32>
      %60 = vector.extract_strided_slice %53 {offsets = [0, 0], sizes = [8, 128], strides = [1, 1]} : vector<8x384xf32> to vector<8x128xf32>
      %61 = vector.extract_strided_slice %59 {offsets = [0, 0], sizes = [8, 128], strides = [1, 1]} : vector<8x384xf32> to vector<8x128xf32>
      %62 = arith.addf %60, %61 : vector<8x128xf32>
      %63 = arith.negf %62 : vector<8x128xf32>
      %64 = math.exp %63 : vector<8x128xf32>
      %cst_37 = arith.constant 1.000000e+00 : f32
      %65 = vector.broadcast %cst_37 : f32 to vector<8x128xf32>
      %66 = arith.addf %65, %64 : vector<8x128xf32>
      %67 = arith.divf %65, %66 : vector<8x128xf32>
      %68 = vector.extract_strided_slice %53 {offsets = [0, 128], sizes = [8, 128], strides = [1, 1]} : vector<8x384xf32> to vector<8x128xf32>
      %69 = vector.extract_strided_slice %59 {offsets = [0, 128], sizes = [8, 128], strides = [1, 1]} : vector<8x384xf32> to vector<8x128xf32>
      %70 = arith.addf %68, %69 : vector<8x128xf32>
      %71 = arith.negf %70 : vector<8x128xf32>
      %72 = math.exp %71 : vector<8x128xf32>
      %cst_38 = arith.constant 1.000000e+00 : f32
      %73 = vector.broadcast %cst_38 : f32 to vector<8x128xf32>
      %74 = arith.addf %73, %72 : vector<8x128xf32>
      %75 = arith.divf %73, %74 : vector<8x128xf32>
      %76 = vector.extract_strided_slice %53 {offsets = [0, 256], sizes = [8, 128], strides = [1, 1]} : vector<8x384xf32> to vector<8x128xf32>
      %77 = vector.extract_strided_slice %59 {offsets = [0, 256], sizes = [8, 128], strides = [1, 1]} : vector<8x384xf32> to vector<8x128xf32>
      %78 = arith.mulf %67, %77 : vector<8x128xf32>
      %79 = arith.addf %76, %78 : vector<8x128xf32>
      %80 = math.tanh %79 : vector<8x128xf32>
      %cst_39 = arith.constant 1.000000e+00 : f32
      %81 = vector.broadcast %cst_39 : f32 to vector<8x128xf32>
      %82 = arith.subf %81, %75 : vector<8x128xf32>
      %83 = arith.mulf %82, %80 : vector<8x128xf32>
      %84 = arith.mulf %75, %47 : vector<8x128xf32>
      %85 = arith.addf %83, %84 : vector<8x128xf32>
      %c0_40 = arith.constant 0 : index
      %c0_41 = arith.constant 0 : index
      %86 = vector.load %arg13[%c0_40, %c0_41] : memref<8x128xf32, #tpu.memory_space<vmem>>, vector<8x128xf32>
      tpu.vector_store %arg13[%c0_40, %c0_41], %85 {strides = array<i32>} : memref<8x128xf32, #tpu.memory_space<vmem>>, vector<8x128xf32>,
      %cst_42 = arith.constant 0.000000e+00 : f32
      %87 = vector.broadcast %cst_42 : f32 to vector<8x128xf32>
      %c0_43 = arith.constant 0 : index
      %c0_44 = arith.constant 0 : index
      %88 = vector.load %arg14[%c0_43, %c0_44] : memref<8x128xf32, #tpu.memory_space<vmem>>, vector<8x128xf32>
      tpu.vector_store %arg14[%c0_43, %c0_44], %87 {strides = array<i32>} : memref<8x128xf32, #tpu.memory_space<vmem>>, vector<8x128xf32>,
      %cst_45 = arith.constant -1.000000e+30 : f32
      %89 = vector.broadcast %cst_45 : f32 to vector<8x1xf32>
      %c0_46 = arith.constant 0 : index
      %c0_47 = arith.constant 0 : index
      %90 = vector.load %arg15[%c0_46, %c0_47] : memref<8x1xf32, #tpu.memory_space<vmem>>, vector<8x1xf32>
      tpu.vector_store %arg15[%c0_46, %c0_47], %89 {strides = array<i32>} : memref<8x1xf32, #tpu.memory_space<vmem>>, vector<8x1xf32>,
      %cst_48 = arith.constant 0.000000e+00 : f32
      %91 = vector.broadcast %cst_48 : f32 to vector<8x1xf32>
      %c0_49 = arith.constant 0 : index
      %c0_50 = arith.constant 0 : index
      %92 = vector.load %arg16[%c0_49, %c0_50] : memref<8x1xf32, #tpu.memory_space<vmem>>, vector<8x1xf32>
      tpu.vector_store %arg16[%c0_49, %c0_50], %91 {strides = array<i32>} : memref<8x1xf32, #tpu.memory_space<vmem>>, vector<8x1xf32>,
    } else {
    }
    %c0 = arith.constant 0 : index
    %c0_1 = arith.constant 0 : index
    %3 = vector.load %arg13[%c0, %c0_1] : memref<8x128xf32, #tpu.memory_space<vmem>>, vector<8x128xf32>
    %c0_2 = arith.constant 0 : index
    %c0_3 = arith.constant 0 : index
    %c0_4 = arith.constant 0 : index
    %4 = vector.load %arg3[%c0_2, %c0_3, %c0_4] : memref<8x16x128xbf16, #tpu.memory_space<vmem>>, vector<8x16x128xbf16>
    %5 = arith.extf %4 : vector<8x16x128xbf16> to vector<8x16x128xf32>
    %6 = vector.shape_cast %3 : vector<8x128xf32> to vector<8x1x128xf32>
    %7 = vector.broadcast %6 : vector<8x1x128xf32> to vector<8x16x128xf32>
    %8 = arith.mulf %7, %5 : vector<8x16x128xf32>
    %cst = arith.constant dense<0.000000e+00> : vector<8x16xf32>
    %9 = vector.multi_reduction <add>, %8, %cst [2] : vector<8x16x128xf32> to vector<8x16xf32>
    %c16_i32 = arith.constant 16 : i32
    %10 = arith.muli %arg0, %c16_i32 : i32
    %11 = tpu.iota {dimensions = array<i32: 1>} : vector<8x16xi32>
    %12 = vector.broadcast %10 : i32 to vector<8x16xi32>
    %13 = arith.addi %12, %11 : vector<8x16xi32>
    %c8_i32 = arith.constant 8 : i32
    %14 = vector.broadcast %c8_i32 : i32 to vector<8x16xi32>
    %15 = arith.cmpi slt, %13, %14 : vector<8x16xi32>
    %cst_5 = arith.constant -1.000000e+30 : f32
    %16 = vector.broadcast %cst_5 : f32 to vector<8x16xf32>
    %17 = arith.select %15, %9, %16 : vector<8x16xi1>, vector<8x16xf32>
    %c0_6 = arith.constant 0 : index
    %c0_7 = arith.constant 0 : index
    %18 = vector.load %arg15[%c0_6, %c0_7] : memref<8x1xf32, #tpu.memory_space<vmem>>, vector<8x1xf32>
    %cst_8 = arith.constant dense<0xFF800000> : vector<8xf32>
    %19 = vector.multi_reduction <maximumf>, %17, %cst_8 [1] : vector<8x16xf32> to vector<8xf32>
    %20 = vector.shape_cast %19 : vector<8xf32> to vector<8x1xf32>
    %21 = arith.maximumf %18, %20 : vector<8x1xf32>
    %22 = arith.subf %18, %21 : vector<8x1xf32>
    %23 = math.exp %22 : vector<8x1xf32>
    %24 = vector.broadcast %21 : vector<8x1xf32> to vector<8x16xf32>
    %25 = arith.subf %17, %24 : vector<8x16xf32>
    %26 = math.exp %25 : vector<8x16xf32>
    %c0_9 = arith.constant 0 : index
    %c0_10 = arith.constant 0 : index
    %27 = vector.load %arg16[%c0_9, %c0_10] : memref<8x1xf32, #tpu.memory_space<vmem>>, vector<8x1xf32>
    %28 = arith.mulf %23, %27 : vector<8x1xf32>
    %cst_11 = arith.constant dense<0.000000e+00> : vector<8xf32>
    %29 = vector.multi_reduction <add>, %26, %cst_11 [1] : vector<8x16xf32> to vector<8xf32>
    %30 = vector.shape_cast %29 : vector<8xf32> to vector<8x1xf32>
    %31 = arith.addf %28, %30 : vector<8x1xf32>
    %c0_12 = arith.constant 0 : index
    %c0_13 = arith.constant 0 : index
    %32 = vector.load %arg16[%c0_12, %c0_13] : memref<8x1xf32, #tpu.memory_space<vmem>>, vector<8x1xf32>
    tpu.vector_store %arg16[%c0_12, %c0_13], %31 {strides = array<i32>} : memref<8x1xf32, #tpu.memory_space<vmem>>, vector<8x1xf32>,
    %c0_14 = arith.constant 0 : index
    %c0_15 = arith.constant 0 : index
    %33 = vector.load %arg14[%c0_14, %c0_15] : memref<8x128xf32, #tpu.memory_space<vmem>>, vector<8x128xf32>
    %34 = vector.broadcast %23 : vector<8x1xf32> to vector<8x128xf32>
    %35 = arith.mulf %34, %33 : vector<8x128xf32>
    %36 = vector.shape_cast %26 : vector<8x16xf32> to vector<8x16x1xf32>
    %37 = vector.broadcast %36 : vector<8x16x1xf32> to vector<8x16x128xf32>
    %38 = arith.mulf %37, %5 : vector<8x16x128xf32>
    %cst_16 = arith.constant dense<0.000000e+00> : vector<8x128xf32>
    %39 = vector.multi_reduction <add>, %38, %cst_16 [1] : vector<8x16x128xf32> to vector<8x128xf32>
    %40 = arith.addf %35, %39 : vector<8x128xf32>
    %c0_17 = arith.constant 0 : index
    %c0_18 = arith.constant 0 : index
    %41 = vector.load %arg14[%c0_17, %c0_18] : memref<8x128xf32, #tpu.memory_space<vmem>>, vector<8x128xf32>
    tpu.vector_store %arg14[%c0_17, %c0_18], %40 {strides = array<i32>} : memref<8x128xf32, #tpu.memory_space<vmem>>, vector<8x128xf32>,
    %c0_19 = arith.constant 0 : index
    %c0_20 = arith.constant 0 : index
    %42 = vector.load %arg15[%c0_19, %c0_20] : memref<8x1xf32, #tpu.memory_space<vmem>>, vector<8x1xf32>
    tpu.vector_store %arg15[%c0_19, %c0_20], %21 {strides = array<i32>} : memref<8x1xf32, #tpu.memory_space<vmem>>, vector<8x1xf32>,
    %c0_i32_21 = arith.constant 0 : i32
    %43 = arith.cmpi eq, %arg0, %c0_i32_21 : i32
    %44 = arith.extui %43 : i1 to i32
    %c0_i32_22 = arith.constant 0 : i32
    %45 = arith.cmpi ne, %44, %c0_i32_22 : i32
    scf.if %45 {
      %c0_23 = arith.constant 0 : index
      %c0_24 = arith.constant 0 : index
      %46 = vector.load %arg14[%c0_23, %c0_24] : memref<8x128xf32, #tpu.memory_space<vmem>>, vector<8x128xf32>
      %c0_25 = arith.constant 0 : index
      %c0_26 = arith.constant 0 : index
      %47 = vector.load %arg16[%c0_25, %c0_26] : memref<8x1xf32, #tpu.memory_space<vmem>>, vector<8x1xf32>
      %48 = vector.broadcast %47 : vector<8x1xf32> to vector<8x128xf32>
      %49 = arith.divf %46, %48 : vector<8x128xf32>
      %50 = arith.truncf %3 : vector<8x128xf32> to vector<8x128xbf16>
      %c0_27 = arith.constant 0 : index
      %c0_28 = arith.constant 0 : index
      %51 = vector.load %arg8[%c0_27, %c0_28] : memref<128x128xbf16, #tpu.memory_space<vmem>>, vector<128x128xbf16>
      %cst_29 = arith.constant dense<0.000000e+00> : vector<8x128xf32>
      %52 = tpu.matmul %50, %51, %cst_29 {dimension_numbers = #tpu.dot_dimension_numbers<[1], [0], [0], [1], [0, 0, 1, 1], [], []>} : vector<8x128xbf16>, vector<128x128xbf16>, vector<8x128xf32> -> vector<8x128xf32>
      %53 = arith.truncf %49 : vector<8x128xf32> to vector<8x128xbf16>
      %c0_30 = arith.constant 0 : index
      %c0_31 = arith.constant 0 : index
      %54 = vector.load %arg9[%c0_30, %c0_31] : memref<128x128xbf16, #tpu.memory_space<vmem>>, vector<128x128xbf16>
      %cst_32 = arith.constant dense<0.000000e+00> : vector<8x128xf32>
      %55 = tpu.matmul %53, %54, %cst_32 {dimension_numbers = #tpu.dot_dimension_numbers<[1], [0], [0], [1], [0, 0, 1, 1], [], []>} : vector<8x128xbf16>, vector<128x128xbf16>, vector<8x128xf32> -> vector<8x128xf32>
      %56 = arith.addf %52, %55 : vector<8x128xf32>
      %c0_33 = arith.constant 0 : index
      %c0_34 = arith.constant 0 : index
      %57 = vector.load %arg10[%c0_33, %c0_34] : memref<1x128xf32, #tpu.memory_space<vmem>>, vector<1x128xf32>
      %58 = vector.broadcast %57 : vector<1x128xf32> to vector<8x128xf32>
      %59 = arith.addf %56, %58 : vector<8x128xf32>
      %60 = math.tanh %59 : vector<8x128xf32>
      %c0_35 = arith.constant 0 : index
      %c0_36 = arith.constant 0 : index
      %61 = vector.load %arg11[%c0_35, %c0_36] : memref<8x128xf32, #tpu.memory_space<vmem>>, vector<8x128xf32>
      tpu.vector_store %arg11[%c0_35, %c0_36], %3 {strides = array<i32>} : memref<8x128xf32, #tpu.memory_space<vmem>>, vector<8x128xf32>,
      %c0_37 = arith.constant 0 : index
      %c0_38 = arith.constant 0 : index
      %62 = vector.load %arg12[%c0_37, %c0_38] : memref<8x128xf32, #tpu.memory_space<vmem>>, vector<8x128xf32>
      tpu.vector_store %arg12[%c0_37, %c0_38], %60 {strides = array<i32>} : memref<8x128xf32, #tpu.memory_space<vmem>>, vector<8x128xf32>,
    } else {
    }
    return
  }
  func.func @transform_0(%arg0: i32) -> (i32, i32) {
    %c0_i32 = arith.constant 0 : i32
    %c0_i32_0 = arith.constant 0 : i32
    %c0_i32_1 = arith.constant 0 : i32
    return %c0_i32, %c0_i32_0 : i32, i32
  }
  func.func @transform_1(%arg0: i32) -> (i32, i32) {
    %c0_i32 = arith.constant 0 : i32
    %c0_i32_0 = arith.constant 0 : i32
    %c0_i32_1 = arith.constant 0 : i32
    return %c0_i32, %c0_i32_0 : i32, i32
  }
  func.func @transform_2(%arg0: i32) -> (i32, i32, i32) {
    %c0_i32 = arith.constant 0 : i32
    %c0_i32_0 = arith.constant 0 : i32
    %c0_i32_1 = arith.constant 0 : i32
    return %c0_i32, %arg0, %c0_i32_0 : i32, i32, i32
  }
  func.func @transform_3(%arg0: i32) -> (i32, i32) {
    %c0_i32 = arith.constant 0 : i32
    %c0_i32_0 = arith.constant 0 : i32
    %c0_i32_1 = arith.constant 0 : i32
    return %c0_i32, %c0_i32_0 : i32, i32
  }
  func.func @transform_4(%arg0: i32) -> (i32, i32) {
    %c0_i32 = arith.constant 0 : i32
    %c0_i32_0 = arith.constant 0 : i32
    %c0_i32_1 = arith.constant 0 : i32
    return %c0_i32, %c0_i32_0 : i32, i32
  }
  func.func @transform_5(%arg0: i32) -> (i32, i32) {
    %c0_i32 = arith.constant 0 : i32
    %c0_i32_0 = arith.constant 0 : i32
    %c0_i32_1 = arith.constant 0 : i32
    return %c0_i32, %c0_i32_0 : i32, i32
  }
  func.func @transform_6(%arg0: i32) -> (i32, i32) {
    %c0_i32 = arith.constant 0 : i32
    %c0_i32_0 = arith.constant 0 : i32
    %c0_i32_1 = arith.constant 0 : i32
    return %c0_i32, %c0_i32_0 : i32, i32
  }
  func.func @transform_7(%arg0: i32) -> (i32, i32) {
    %c0_i32 = arith.constant 0 : i32
    %c0_i32_0 = arith.constant 0 : i32
    %c0_i32_1 = arith.constant 0 : i32
    return %c0_i32, %c0_i32_0 : i32, i32
  }
  func.func @transform_8(%arg0: i32) -> (i32, i32) {
    %c0_i32 = arith.constant 0 : i32
    %c0_i32_0 = arith.constant 0 : i32
    %c0_i32_1 = arith.constant 0 : i32
    return %c0_i32, %c0_i32_0 : i32, i32
  }
  func.func @transform_9(%arg0: i32) -> (i32, i32) {
    %c0_i32 = arith.constant 0 : i32
    %c0_i32_0 = arith.constant 0 : i32
    %c0_i32_1 = arith.constant 0 : i32
    return %c0_i32, %c0_i32_0 : i32, i32
  }
  func.func @transform_10(%arg0: i32) -> (i32, i32) {
    %c0_i32 = arith.constant 0 : i32
    %c0_i32_0 = arith.constant 0 : i32
    %c0_i32_1 = arith.constant 0 : i32
    return %c0_i32, %c0_i32_0 : i32, i32
  }
  func.func @transform_11(%arg0: i32) -> (i32, i32) {
    %c0_i32 = arith.constant 0 : i32
    %c0_i32_0 = arith.constant 0 : i32
    %c0_i32_1 = arith.constant 0 : i32
    return %c0_i32, %c0_i32_0 : i32, i32
  }
}

</mosaic_0001>

<bundles_post_ra>
// kernel: luong_attn_decoder_forward.3
= control target key start
LH: loop header
LB: loop body
LE: loop exit
PB: predicated region body
PF: predicated region fallthrough
CT: control target
= control target key end

     0   :  { %v181_v0 = vmov 0.0   ;;  %vm182_vm0 = vmmov 0   ;;  %s236_s1 = inlined_call_operand.vmem [shape: bf16[1,128,128], index: 1, kind: input, shape index: {}]   ;;  %s237_s0 = inlined_call_operand.vmem [shape: f32[8,128], index: 0, kind: input, shape index: {}]   ;;  %s238_s2 = inlined_call_operand.vmem [shape: f32[1,128], index: 2, kind: input, shape index: {}]   ;;  %s239_s3 = inlined_call_operand.vmem [shape: f32[8,128], index: 3, kind: output, shape index: {}]  }
   0x1   :  { %151 = vmatprep.subr.bf16.mxu0 %v181_v0  ;;  %v173_v1 = vld [vmem:[%s236_s1] sm:$0xff]   ;;  %167 = vmatprep.mubr.msk.bf16.mxu0 %vm182_vm0, %v181_v0  ;;  %v174_v2 = vld [vmem:[%s236_s1 + $0x8] sm:$0xff]   ;;  %v175_v3 = vld [vmem:[%s236_s1 + $0x10] sm:$0xff]  }
   0x2   :  { %152 = vmatpush3.bf16.msra.mxu0 %v173_v1  ;;  %v176_v4 = vld [vmem:[%s236_s1 + $0x18] sm:$0xff]   ;;  %v177_v5 = vld [vmem:[%s236_s1 + $0x20] sm:$0xff]   ;;  %v178_v6 = vld [vmem:[%s236_s1 + $0x28] sm:$0xff]  }
   0x3   :  { %153 = vmatprep.subr.bf16.mxu0 %v181_v0  ;;  %v179_v7 = vld [vmem:[%s236_s1 + $0x30] sm:$0xff]   ;;  %v180_v8 = vld [vmem:[%s236_s1 + $0x38] sm:$0xff]   ;;  %v15_v9 = vld [vmem:[%s237_s0] sm:$0xff] }
   0x4   :  { %v16_v10 = vpack.c.bf16 %v15_v9, %v15_v9  ;;  %v133_v11 = vld [vmem:[%s238_s2] ss:$0 sm:$0xff] }
   0x6   :  { %154 = vmatpush3.bf16.msra.mxu0 %v174_v2 }
   0x7   :  { %155 = vmatprep.subr.bf16.mxu0 %v181_v0 }
   0xa   :  { %156 = vmatpush3.bf16.msra.mxu0 %v175_v3 }
   0xb   :  { %157 = vmatprep.subr.bf16.mxu0 %v181_v0 }
   0xe   :  { %158 = vmatpush3.bf16.msra.mxu0 %v176_v4 }
   0xf   :  { %159 = vmatprep.subr.bf16.mxu0 %v181_v0 }
  0x12   :  { %160 = vmatpush3.bf16.msra.mxu0 %v177_v5 }
  0x13   :  { %161 = vmatprep.subr.bf16.mxu0 %v181_v0 }
  0x16   :  { %162 = vmatpush3.bf16.msra.mxu0 %v178_v6 }
  0x17   :  { %163 = vmatprep.subr.bf16.mxu0 %v181_v0 }
  0x1a   :  { %164 = vmatpush3.bf16.msra.mxu0 %v179_v7 }
  0x1b   :  { %165 = vmatprep.subr.bf16.mxu0 %v181_v0 }
  0x1e   :  { %166 = vmatpush3.bf16.msra.mxu0 %v180_v8 }
  0x21   :  { %168 = vmatmul.mubr.bf16.vlgmr.msra.gmra.mrb[0].mxu0 %v16_v10 }
  0xf4   :  { %v122_v12 = vpop.f32.mrb[0].mxu0 }
  0xf5   :  { %v123_v13 = vadd.f32 %v133_v11, %v122_v12  ;;  %v169_v14 = vpop.f32.mrb[1].mxu0 }
  0xf6   :  { %v125_v15 = vpop.f32.mrb[2].mxu0 }
  0xf7   :  { %128 = vst [vmem:[%s239_s3] sm:$0xff] %v123_v13  ;;  %v170_v16 = vpop.f32.mrb[3].mxu0 }

// kernel: luong_attn_decoder_forward.2
= control target key start
LH: loop header
LB: loop body
LE: loop exit
PB: predicated region body
PF: predicated region fallthrough
CT: control target
= control target key end

     0   :  { %17 = vsyncpa [#allocation7], 0  ;;  %s2206_s0 = inlined_call_operand.vmem [shape: f32[8,128], index: 0, kind: input, shape index: {}]   ;;  %s2207_s1 = inlined_call_operand.vmem [shape: f32[8,128], index: 1, kind: input, shape index: {}]   ;;  %s2208_s2 = inlined_call_operand.vmem [shape: bf16[8,16,128], index: 2, kind: input, shape index: {}]   ;;  %s2209_s3 = inlined_call_operand.hbm [shape: bf16[128,384], index: 3, kind: input, shape index: {}]   ;;  %s2210_s4 = inlined_call_operand.hbm [shape: bf16[128,384], index: 4, kind: input, shape index: {}]   ;;  %s2211_s5 = inlined_call_operand.vmem [shape: f32[1,384], index: 5, kind: input, shape index: {}]   ;;  %s2212_s6 = inlined_call_operand.vmem [shape: f32[1,384], index: 6, kind: input, shape index: {}]   ;;  %s2213_s7 = inlined_call_operand.hbm [shape: bf16[128,128], index: 7, kind: input, shape index: {}]   ;;  %s2214_s8 = inlined_call_operand.hbm [shape: bf16[128,128], index: 8, kind: input, shape index: {}]   ;;  %s2215_s9 = inlined_call_operand.vmem [shape: f32[1,128], index: 9, kind: input, shape index: {}]   ;;  %s2216_s10 = inlined_call_operand.vmem [shape: f32[8,128], index: 10, kind: output, shape index: {0}]   ;;  %s2217_s11 = inlined_call_operand.vmem [shape: f32[8,128], index: 11, kind: output, shape index: {1}]  }
   0x1   :  { %18 = vsyncpa [#allocation9], 0 }
   0x2   :  { %19 = vsyncpa [#allocation12], 0  ;;  %s1818_s17 = smov [#allocation8]   ;;  %s1819_s19 = smov [#allocation6]  }
   0x3   :  { %s43_s18 = sshll.u32 %s1818_s17, 4  ;;  %s31_s20 = sshll.u32 %s1819_s19, 4  ;;  %s44_s18 = int_to_ptr.vmem [resolvable:$true] %s43_s18  ;;  %s1891_s20 = int_to_ptr.vmem [resolvable:$true] %s31_s20 }
   0x4   :  { %s1724_s23 = scalar_lea.hbm %s2210_s4, 3072 }
   0x5   :  { %p1725_p0 = scmp.ne.s32.totalorder %s2210_s4, %s1724_s23  ;;  %p1728_p1 = scmp.lt.u32.totalorder %s1724_s23, %s2210_s4 }
   0x7   :  { %p1730_p2 = pnand %p1728_p1, %p1725_p0 }
   0x9   :  { %1733 = shalt.err (!%p1730_p2)
}
   0xa   :  { %s1734_s28 = scalar_lea.vmem %s44_s18, 3072  ;;  %p1739_p4 = scmp.lt.s32.totalorder %s44_s18, %s44_s18 }
   0xb   :  { %p1735_p3 = scmp.ne.s32.totalorder %s44_s18, %s1734_s28  ;;  %p1740_p5 = scmp.lt.s32.totalorder %s1734_s28, %s1734_s28 }
   0xd   :  { %p1741_p6 = por %p1740_p5, %p1739_p4 }
   0xf   :  { %p1742_p7 = pnand %p1741_p6, %p1735_p3 }
  0x11   :  { %1745 = shalt.err (!%p1742_p7)
}
  0x12   :  { %s1820_s29 = smov 192   ;;  %s1821_s30 = smov 12  }
  0x13   :  { %49 = dma.hbm_to_vmem [thread:$0]  %s2210_s4, 3072, %s44_s18, [#allocation9], %s1820_s29, %s1820_s29, %s1821_s30  }
  0x14   :  { %s1746_s16 = scalar_lea.hbm %s2209_s3, 3072 }
  0x15   :  { %p1747_p8 = scmp.ne.s32.totalorder %s2209_s3, %s1746_s16  ;;  %p1750_p9 = scmp.lt.u32.totalorder %s1746_s16, %s2209_s3 }
  0x17   :  { %p1752_p10 = pnand %p1750_p9, %p1747_p8 }
  0x19   :  { %1755 = shalt.err (!%p1752_p10)
}
  0x1a   :  { %s1756_s23 = scalar_lea.vmem %s1891_s20, 3072  ;;  %p1761_p12 = scmp.lt.s32.totalorder %s1891_s20, %s1891_s20 }
  0x1b   :  { %p1757_p11 = scmp.ne.s32.totalorder %s1891_s20, %s1756_s23  ;;  %p1762_p13 = scmp.lt.s32.totalorder %s1756_s23, %s1756_s23 }
  0x1d   :  { %p1763_p0 = por %p1762_p13, %p1761_p12 }
  0x1f   :  { %p1764_p1 = pnand %p1763_p0, %p1757_p11 }
  0x21   :  { %1767 = shalt.err (!%p1764_p1)
}
  0x22   :  { %37 = dma.hbm_to_vmem [thread:$0]  %s2209_s3, 3072, %s1891_s20, [#allocation7], %s1820_s29, %s1820_s29, %s1821_s30  }
  0x23   :  { %s1822_s24 = smov [#allocation10]   ;;  %s1768_s28 = scalar_lea.hbm %s2213_s7, 1024 }
  0x24   :  { %s59_s25 = sshll.u32 %s1822_s24, 4  ;;  %p1769_p2 = scmp.ne.s32.totalorder %s2213_s7, %s1768_s28  ;;  %s60_s25 = int_to_ptr.vmem [resolvable:$true] %s59_s25 }
  0x25   :  { %p1772_p3 = scmp.lt.u32.totalorder %s1768_s28, %s2213_s7 }
  0x27   :  { %p1774_p4 = pnand %p1772_p3, %p1769_p2 }
  0x29   :  { %1777 = shalt.err (!%p1774_p4)
}
  0x2a   :  { %s1778_s16 = scalar_lea.vmem %s60_s25, 1024  ;;  %p1783_p6 = scmp.lt.s32.totalorder %s60_s25, %s60_s25 }
  0x2b   :  { %p1779_p5 = scmp.ne.s32.totalorder %s60_s25, %s1778_s16  ;;  %p1784_p7 = scmp.lt.s32.totalorder %s1778_s16, %s1778_s16 }
  0x2d   :  { %p1785_p8 = por %p1784_p7, %p1783_p6 }
  0x2f   :  { %p1786_p9 = pnand %p1785_p8, %p1779_p5 }
  0x31   :  { %1789 = shalt.err (!%p1786_p9)
}
  0x32   :  { %s1823_s3 = smov 64   ;;  %s1824_s20 = smov 4  }
  0x33   :  { %65 = dma.hbm_to_vmem [thread:$0]  %s2213_s7, 1024, %s60_s25, [#allocation9], %s1823_s3, %s1823_s3, %s1824_s20  }
  0x34   :  { %s1825_s17 = smov [#allocation11]   ;;  %s1790_s23 = scalar_lea.hbm %s2214_s8, 1024 }
  0x35   :  { %s71_s19 = sshll.u32 %s1825_s17, 4  ;;  %p1791_p10 = scmp.ne.s32.totalorder %s2214_s8, %s1790_s23  ;;  %s72_s19 = int_to_ptr.vmem [resolvable:$true] %s71_s19 }
  0x36   :  { %p1794_p11 = scmp.lt.u32.totalorder %s1790_s23, %s2214_s8 }
  0x38   :  { %p1796_p12 = pnand %p1794_p11, %p1791_p10 }
  0x3a   :  { %1799 = shalt.err (!%p1796_p12)
}
  0x3b   :  { %s1800_s27 = scalar_lea.vmem %s72_s19, 1024  ;;  %p1805_p0 = scmp.lt.s32.totalorder %s72_s19, %s72_s19 }
  0x3c   :  { %p1801_p13 = scmp.ne.s32.totalorder %s72_s19, %s1800_s27  ;;  %p1806_p1 = scmp.lt.s32.totalorder %s1800_s27, %s1800_s27 }
  0x3e   :  { %p1807_p2 = por %p1806_p1, %p1805_p0 }
  0x40   :  { %p1808_p3 = pnand %p1807_p2, %p1801_p13 }
  0x42   :  { %1811 = shalt.err (!%p1808_p3)
}
  0x43   :  { %77 = dma.hbm_to_vmem [thread:$0]  %s2214_s8, 1024, %s72_s19, [#allocation12], %s1823_s3, %s1823_s3, %s1824_s20  }
  0x44   :  { %1812 = dma.done.wait [#allocation7], 3072  }
  0x45   :  { %1813 = vsyncadd [#allocation7], 4294964224 }
  0x46   :  { %1814 = dma.done.wait [#allocation9], 4096  }
  0x47   :  { %1815 = vsyncadd [#allocation9], 4294963200 }
  0x48   :  { %1816 = dma.done.wait [#allocation12], 1024  }
  0x49   :  { %1817 = vsyncadd [#allocation12], 4294966272  ;;  %v1826_v0 = vmov 0.0   ;;  %v1827_v1 = vmov 0   ;;  %vm1828_vm0 = vmmov 0   ;;  %v97_v23 = vld [vmem:[%s2206_s0] sm:$0xff] }
  0x4a   :  { %1523 = vmatprep.subr.bf16.mxu1 %v1826_v0  ;;  %309 = vmatprep.mubr.bf16.mxu0 %v1827_v1  ;;  %v1626_v2 = vld [vmem:[#allocation6 + $0x4] ss:$12 sps:$4 sm:$0xff]   ;;  %v1628_v3 = vld [vmem:[#allocation6] ss:$12 sps:$4 sm:$0xff]   ;;  %v1629_v4 = vld [vmem:[#allocation6 + $0x1c] ss:$12 sps:$4 sm:$0xff]   ;;  %v99_v26 = vpack.c.bf16 %v97_v23, %v97_v23 }
  0x4b   :  { %1539 = vmatprep.mubr.msk.bf16.mxu1 %vm1828_vm0, %v1826_v0  ;;  %1624 = vset.pattern.permute.xlu1 %v1827_v1  ;;  %v1631_v5 = vld [vmem:[#allocation6 + $0x18] ss:$12 sps:$4 sm:$0xff]   ;;  %v1632_v6 = vld [vmem:[#allocation6 + $0x34] ss:$12 sps:$4 sm:$0xff]   ;;  %v1634_v7 = vld [vmem:[#allocation6 + $0x30] ss:$12 sps:$4 sm:$0xff]  }
  0x4c   :  { %1625 = vset.pattern.permute.xlu0 %v1827_v1  ;;  %277 = vmatprep.subr.bf16.mxu0 %v1626_v2  ;;  %v1635_v8 = vld [vmem:[#allocation6 + $0x4c] ss:$12 sps:$4 sm:$0xff]   ;;  %v1646_v9 = vld [vmem:[#allocation6 + $0x8] ss:$12 sps:$4 sm:$0xff]   ;;  %v1638_v11 = vld [vmem:[#allocation6 + $0x64] ss:$12 sps:$4 sm:$0xff]  }
  0x4d   :  { %278 = vmatpush1.bf16.msra.mxu0 %v1628_v3  ;;  %v1637_v10 = vld [vmem:[#allocation6 + $0x48] ss:$12 sps:$4 sm:$0xff]   ;;  %1524 = vmatpush3.bf16.msra.mxu1 %v1646_v9  ;;  %v1650_v12 = vld [vmem:[#allocation6 + $0x20] ss:$12 sps:$4 sm:$0xff]   ;;  %v1652_v14 = vld [vmem:[#allocation6 + $0x38] ss:$12 sps:$4 sm:$0xff]   ;;  %v134_v3 = vlaneseq }
  0x4e   :  { %279 = vmatprep.subr.bf16.mxu0 %v1629_v4  ;;  %1525 = vmatprep.subr.bf16.mxu1 %v1826_v0  ;;  %v1640_v13 = vld [vmem:[#allocation6 + $0x60] ss:$12 sps:$4 sm:$0xff]   ;;  %v1641_v15 = vld [vmem:[#allocation6 + $0x7c] ss:$12 sps:$4 sm:$0xff]   ;;  %v1643_v16 = vld [vmem:[#allocation6 + $0x78] ss:$12 sps:$4 sm:$0xff]  }
  0x4f   :  { %v1656_v17 = vld [vmem:[#allocation6 + $0x50] ss:$12 sps:$4 sm:$0xff]   ;;  %v1644_v18 = vld [vmem:[#allocation6 + $0x94] ss:$12 sps:$4 sm:$0xff]   ;;  %v1648_v21 = vld [vmem:[#allocation6 + $0xac] ss:$12 sps:$4 sm:$0xff]  }
  0x50   :  { %v1647_v19 = vld [vmem:[#allocation6 + $0x90] ss:$12 sps:$4 sm:$0xff]   ;;  %v1660_v20 = vld [vmem:[#allocation6 + $0x68] ss:$12 sps:$4 sm:$0xff]   ;;  %v1664_v24 = vld [vmem:[#allocation6 + $0x80] ss:$12 sps:$4 sm:$0xff]  }
  0x51   :  { %280 = vmatpush1.bf16.msra.mxu0 %v1631_v5  ;;  %1526 = vmatpush3.bf16.msra.mxu1 %v1650_v12  ;;  %v1651_v22 = vld [vmem:[#allocation6 + $0xa8] ss:$12 sps:$4 sm:$0xff]   ;;  %v1655_v25 = vld [vmem:[#allocation8 + $0x4] ss:$12 sps:$4 sm:$0xff]   ;;  %v1653_v27 = vld [vmem:[#allocation8] ss:$12 sps:$4 sm:$0xff]  }
  0x52   :  { %281 = vmatprep.subr.bf16.mxu0 %v1632_v6  ;;  %1527 = vmatprep.subr.bf16.mxu1 %v1826_v0  ;;  %v1668_v28 = vld [vmem:[#allocation6 + $0x98] ss:$12 sps:$4 sm:$0xff]   ;;  %v1659_v29 = vld [vmem:[#allocation8 + $0x1c] ss:$12 sps:$4 sm:$0xff]   ;;  %v1663_v32 = vld [vmem:[#allocation8 + $0x34] ss:$12 sps:$4 sm:$0xff]  }
  0x53   :  { %v1657_v30 = vld [vmem:[#allocation8 + $0x18] ss:$12 sps:$4 sm:$0xff]   ;;  %v1672_v31 = vld [vmem:[#allocation6 + $0xb0] ss:$12 sps:$4 sm:$0xff]   ;;  %v1679_v35 = vld [vmem:[#allocation8 + $0x8] ss:$12 sps:$4 sm:$0xff]  }
  0x54   :  { %v1661_v33 = vld [vmem:[#allocation8 + $0x30] ss:$12 sps:$4 sm:$0xff]   ;;  %v1667_v34 = vld [vmem:[#allocation8 + $0x4c] ss:$12 sps:$4 sm:$0xff]   ;;  %v1665_v36 = vld [vmem:[#allocation8 + $0x48] ss:$12 sps:$4 sm:$0xff]  }
  0x55   :  { %282 = vmatpush1.bf16.msra.mxu0 %v1634_v7  ;;  %1528 = vmatpush3.bf16.msra.mxu1 %v1652_v14  ;;  %v1683_v37 = vld [vmem:[#allocation8 + $0x20] ss:$12 sps:$4 sm:$0xff]   ;;  %v1671_v38 = vld [vmem:[#allocation8 + $0x64] ss:$12 sps:$4 sm:$0xff]   ;;  %v1675_v41 = vld [vmem:[#allocation8 + $0x7c] ss:$12 sps:$4 sm:$0xff]  }
  0x56   :  { %283 = vmatprep.subr.bf16.mxu0 %v1635_v8  ;;  %1529 = vmatprep.subr.bf16.mxu1 %v1826_v0  ;;  %v1669_v39 = vld [vmem:[#allocation8 + $0x60] ss:$12 sps:$4 sm:$0xff]   ;;  %v1684_v40 = vld [vmem:[#allocation8 + $0x38] ss:$12 sps:$4 sm:$0xff]   ;;  %v1685_v43 = vld [vmem:[#allocation8 + $0x50] ss:$12 sps:$4 sm:$0xff]  }
  0x57   :  { %v1673_v42 = vld [vmem:[#allocation8 + $0x78] ss:$12 sps:$4 sm:$0xff]   ;;  %v1678_v44 = vld [vmem:[#allocation8 + $0x94] ss:$12 sps:$4 sm:$0xff]   ;;  %v1676_v45 = vld [vmem:[#allocation8 + $0x90] ss:$12 sps:$4 sm:$0xff]  }
  0x58   :  { %v1686_v46 = vld [vmem:[#allocation8 + $0x68] ss:$12 sps:$4 sm:$0xff]   ;;  %v1682_v47 = vld [vmem:[#allocation8 + $0xac] ss:$12 sps:$4 sm:$0xff]   ;;  %v1689_v53 = vld [vmem:[#allocation8 + $0xb0] ss:$12 sps:$4 sm:$0xff]  }
  0x59   :  { %284 = vmatpush1.bf16.msra.mxu0 %v1637_v10  ;;  %1530 = vmatpush3.bf16.msra.mxu1 %v1656_v17  ;;  %v1680_v48 = vld [vmem:[#allocation8 + $0xa8] ss:$12 sps:$4 sm:$0xff]   ;;  %v1687_v50 = vld [vmem:[#allocation8 + $0x80] ss:$12 sps:$4 sm:$0xff]   ;;  %v1688_v52 = vld [vmem:[#allocation8 + $0x98] ss:$12 sps:$4 sm:$0xff]  }
  0x5a   :  { %285 = vmatprep.subr.bf16.mxu0 %v1638_v11  ;;  %1531 = vmatprep.subr.bf16.mxu1 %v1826_v0  ;;  %v1973_v49 = vld [vmem:[%s2207_s1] sm:$0xff]  ;;  %v1690_v54 = vld [vmem:[#allocation10] sm:$0xff]   ;;  %v1691_v55 = vld [vmem:[#allocation10 + $0x8] sm:$0xff]   ;;  %v1994_v4 = vshrl.u32 %v134_v3, 7  ;;  %vm640_vm1 = vcmask 7168   ;;  %vm845_vm2 = vcmask 130112  }
  0x5b   :  { %v358_v51 = vpack.c.bf16 %v1973_v49, %v1973_v49  ;;  %v1692_v56 = vld [vmem:[#allocation10 + $0x10] sm:$0xff]   ;;  %v1693_v57 = vld [vmem:[#allocation10 + $0x18] sm:$0xff]   ;;  %v1694_v58 = vld [vmem:[#allocation10 + $0x20] sm:$0xff]   ;;  %642 = vst.msk [vmem:[#allocation5] sm:$0xff] %vm640_vm1, %v1826_v0  ;;  %vm910_vm3 = vcmask 1041409   ;;  %vm912_vm4 = vcmask 1042434  }
  0x5c   :  { %v1695_v59 = vld [vmem:[#allocation10 + $0x28] sm:$0xff]   ;;  %v1696_v60 = vld [vmem:[#allocation10 + $0x30] sm:$0xff]   ;;  %v1697_v61 = vld [vmem:[#allocation10 + $0x38] sm:$0xff]   ;;  %v1997_v5 = vsub.s32 0, %v1994_v4  ;;  %v2006_v8 = vsub.s32 1, %v1994_v4  ;;  %vm914_vm5 = vcmask 1043459  }
  0x5d   :  { %286 = vmatpush1.bf16.msra.mxu0 %v1640_v13  ;;  %1532 = vmatpush3.bf16.msra.mxu1 %v1660_v20  ;;  %v391_v6 = vld [vmem:[%s2212_s6] sm:$0x7]  ;;  %vm916_vm6 = vcmask 1044484   ;;  %vm918_vm7 = vcmask 1045509   ;;  %vm920_vm8 = vcmask 1046534   ;;  %vm922_vm9 = vcmask 1047559  }
  0x5e   :  { %287 = vmatprep.subr.bf16.mxu0 %v1641_v15  ;;  %1533 = vmatprep.subr.bf16.mxu1 %v1826_v0  ;;  %v132_v7 = vld [vmem:[%s2211_s5] sm:$0x7]  ;;  %v396_v10 = vrot.slane %v391_v6, %v1997_v5  ;;  %v400_v12 = vrot.slane %v391_v6, %v2006_v8  ;;  %vm927_vm11 = vcmask 130048  }
  0x5f   :  { %v137_v9 = vrot.slane %v132_v7, %v1997_v5  ;;  %v141_v11 = vrot.slane %v132_v7, %v2006_v8 }
  0x61   :  { %288 = vmatpush1.bf16.msra.mxu0 %v1643_v16  ;;  %1534 = vmatpush3.bf16.msra.mxu1 %v1664_v24  ;;  %v1603_v13 = vadd.f32 %v396_v10, %v137_v9  ;;  %v1605_v15 = vadd.f32 %v400_v12, %v141_v11  ;;  %v2054_v12 = vld [vmem:[%s2208_s2 + $0x20] sm:$0xff]  }
  0x62   :  { %289 = vmatprep.subr.bf16.mxu0 %v1644_v18  ;;  %1535 = vmatprep.subr.bf16.mxu1 %v1826_v0 }
  0x65   :  { %290 = vmatpush1.bf16.msra.mxu0 %v1647_v19  ;;  %1536 = vmatpush3.bf16.msra.mxu1 %v1668_v28 }
  0x66   :  { %291 = vmatprep.subr.bf16.mxu0 %v1648_v21  ;;  %1537 = vmatprep.subr.bf16.mxu1 %v1826_v0 }
  0x69   :  { %292 = vmatpush1.bf16.msra.mxu0 %v1651_v22  ;;  %1538 = vmatpush3.bf16.msra.mxu1 %v1672_v31 }
  0x6a   :  { %536 = vmatprep.subr.bf16.mxu0 %v1655_v25  ;;  %1543 = vmatprep.subr.bf16.mxu1 %v1826_v0 }
  0x6c   :  { %310 = vmatmul.mubr.bf16.vlgmr.msra.gmra.mrb[0].mxu0 %v99_v26  ;;  %1540 = vmatmul.mubr.bf16.vlgmr.msra.gmra.mrb[0].mxu1 %v99_v26 }
  0x6d   :  { %537 = vmatpush1.bf16.msra.mxu0 %v1653_v27  ;;  %568 = vmatprep.mubr.bf16.mxu0 %v1827_v1 }
  0x6e   :  { %538 = vmatprep.subr.bf16.mxu0 %v1659_v29  ;;  %1544 = vmatpush3.bf16.msra.mxu1 %v1679_v35  ;;  %v2013_v29 = vsub.s32 2, %v1994_v4 }
  0x6f   :  { %1545 = vmatprep.subr.bf16.mxu1 %v1826_v0  ;;  %1559 = vmatprep.mubr.msk.bf16.mxu1 %vm1828_vm0, %v1826_v0 }
  0x71   :  { %539 = vmatpush1.bf16.msra.mxu0 %v1657_v30  ;;  %v404_v30 = vrot.slane %v391_v6, %v2013_v29 }
  0x72   :  { %540 = vmatprep.subr.bf16.mxu0 %v1663_v32  ;;  %1546 = vmatpush3.bf16.msra.mxu1 %v1683_v37  ;;  %v145_v32 = vrot.slane %v132_v7, %v2013_v29 }
  0x73   :  { %1547 = vmatprep.subr.bf16.mxu1 %v1826_v0 }
  0x75   :  { %541 = vmatpush1.bf16.msra.mxu0 %v1661_v33 }
  0x76   :  { %542 = vmatprep.subr.bf16.mxu0 %v1667_v34  ;;  %1548 = vmatpush3.bf16.msra.mxu1 %v1684_v40 }
  0x77   :  { %1549 = vmatprep.subr.bf16.mxu1 %v1826_v0 }
  0x79   :  { %543 = vmatpush1.bf16.msra.mxu0 %v1665_v36 }
  0x7a   :  { %544 = vmatprep.subr.bf16.mxu0 %v1671_v38  ;;  %1550 = vmatpush3.bf16.msra.mxu1 %v1685_v43 }
  0x7b   :  { %1551 = vmatprep.subr.bf16.mxu1 %v1826_v0 }
  0x7d   :  { %545 = vmatpush1.bf16.msra.mxu0 %v1669_v39  ;;  %v1829_v39 = vmov 1966171168  }
  0x7e   :  { %546 = vmatprep.subr.bf16.mxu0 %v1675_v41  ;;  %1552 = vmatpush3.bf16.msra.mxu1 %v1686_v46  ;;  %v679_v40 = vunpack.c.l.s4 %v1829_v39 }
  0x7f   :  { %1553 = vmatprep.subr.bf16.mxu1 %v1826_v0 }
  0x81   :  { %547 = vmatpush1.bf16.msra.mxu0 %v1673_v42  ;;  %v680_v42 = vunpack.c.0.s8 %v679_v40 }
  0x82   :  { %548 = vmatprep.subr.bf16.mxu0 %v1678_v44  ;;  %1554 = vmatpush3.bf16.msra.mxu1 %v1687_v50  ;;  %v2022_v50 = vld [vmem:[%s2208_s2] sm:$0xff]  }
  0x83   :  { %1555 = vmatprep.subr.bf16.mxu1 %v1826_v0 }
  0x85   :  { %549 = vmatpush1.bf16.msra.mxu0 %v1676_v45 }
  0x86   :  { %550 = vmatprep.subr.bf16.mxu0 %v1682_v47  ;;  %1556 = vmatpush3.bf16.msra.mxu1 %v1688_v52  ;;  %v683_v47 = vsub.s32 %v680_v42, %v1994_v4 }
  0x87   :  { %1557 = vmatprep.subr.bf16.mxu1 %v1826_v0 }
  0x89   :  { %551 = vmatpush1.bf16.msra.mxu0 %v1680_v48 }
  0x8a   :  { %1563 = vmatprep.subr.bf16.mxu0 %v1826_v0  ;;  %1558 = vmatpush3.bf16.msra.mxu1 %v1689_v53  ;;  %v2030_v53 = vld [vmem:[%s2208_s2 + $0x8] sm:$0xff]  }
  0x8b   :  { %1583 = vmatprep.subr.bf16.mxu1 %v1826_v0  ;;  %v1455_v7 = vunpack.c.h.bf16 %v2030_v53 }
  0x8c   :  { %569 = vmatmul.mubr.bf16.vlgmr.msra.gmra.mrb[0].mxu0 %v358_v51 }
  0x8d   :  { %1579 = vmatprep.mubr.msk.bf16.mxu0 %vm1828_vm0, %v1826_v0  ;;  %1560 = vmatmul.mubr.bf16.vlgmr.msra.gmra.mrb[4].mxu1 %v358_v51 }
  0x8e   :  { %1599 = vmatprep.mubr.msk.bf16.mxu1 %vm1828_vm0, %v1826_v0  ;;  %1584 = vmatpush3.bf16.msra.mxu1 %v1690_v54 }
  0x8f   :  { %1585 = vmatprep.subr.bf16.mxu1 %v1826_v0 }
  0x92   :  { %1586 = vmatpush3.bf16.msra.mxu1 %v1691_v55 }
  0x93   :  { %1587 = vmatprep.subr.bf16.mxu1 %v1826_v0 }
  0x96   :  { %1588 = vmatpush3.bf16.msra.mxu1 %v1692_v56 }
  0x97   :  { %1589 = vmatprep.subr.bf16.mxu1 %v1826_v0 }
  0x9a   :  { %1590 = vmatpush3.bf16.msra.mxu1 %v1693_v57 }
  0x9b   :  { %1591 = vmatprep.subr.bf16.mxu1 %v1826_v0 }
  0x9e   :  { %1592 = vmatpush3.bf16.msra.mxu1 %v1694_v58  ;;  %v1454_v58 = vunpack.c.l.bf16 %v2030_v53 }
  0x9f   :  { %1593 = vmatprep.subr.bf16.mxu1 %v1826_v0 }
  0xa2   :  { %1594 = vmatpush3.bf16.msra.mxu1 %v1695_v59 }
  0xa3   :  { %1595 = vmatprep.subr.bf16.mxu1 %v1826_v0 }
  0xa6   :  { %1596 = vmatpush3.bf16.msra.mxu1 %v1696_v60  ;;  %v1451_v60 = vunpack.c.h.bf16 %v2022_v50 }
  0xa7   :  { %1597 = vmatprep.subr.bf16.mxu1 %v1826_v0 }
  0xaa   :  { %1598 = vmatpush3.bf16.msra.mxu1 %v1697_v61 }
 0x13f   :  { %v352_v62 = vpop.f32.mrb[0].mxu1 }
 0x140   :  { %v1541_v63 = vpop.f32.mrb[1].mxu1  ;;  %v353_v36 = vadd.f32 %v352_v62, %v145_v32 }
 0x141   :  { %v355_v1 = vpop.f32.mrb[2].mxu1 }
 0x142   :  { %v1542_v2 = vpop.f32.mrb[3].mxu1 }
 0x143   :  { %v2042_v2 = vld [vmem:[%s2208_s2 + $0x10] sm:$0xff]  }
 0x144   :  { %v1458_v10 = vunpack.c.l.bf16 %v2042_v2 }
 0x15f   :  { %v570_v14 = vpop.f32.mrb[0].mxu0 }
 0x160   :  { %v1604_v16 = vadd.f32 %v1603_v13, %v570_v14  ;;  %v572_v17 = vpop.f32.mrb[1].mxu0  ;;  %v611_v23 = vpop.f32.mrb[4].mxu1 }
 0x161   :  { %v574_v18 = vpop.f32.mrb[2].mxu0  ;;  %v1606_v21 = vadd.f32 %v1605_v15, %v572_v17  ;;  %v1561_v24 = vpop.f32.mrb[5].mxu1  ;;  %v612_v34 = vadd.f32 %v611_v23, %v404_v30  ;;  %v1459_v15 = vunpack.c.h.bf16 %v2042_v2  ;;  %v1467_v23 = vunpack.c.h.bf16 %v2054_v12 }
 0x162   :  { %v1429_v19 = vmul.f32 -1.442695, %v1604_v16  ;;  %v575_v20 = vpop.f32.mrb[3].mxu0  ;;  %v614_v25 = vpop.f32.mrb[6].mxu1  ;;  %v1466_v16 = vunpack.c.l.bf16 %v2054_v12 }
 0x163   :  { %v1430_v22 = vmul.f32 -1.442695, %v1606_v21  ;;  %v1562_v26 = vpop.f32.mrb[7].mxu1  ;;  %v2066_v21 = vld [vmem:[%s2208_s2 + $0x18] sm:$0xff]  }
 0x164   :  { %1706 = vpow2.f32 %v1429_v19  ;;  %v1462_v25 = vunpack.c.l.bf16 %v2066_v21 }
 0x165   :  { %1708 = vpow2.f32 %v1430_v22 }
 0x16e   :  { %v1707_v27 = vpop.eup %1706 }
 0x16f   :  { %v621_v28 = vadd.f32 1.0, %v1707_v27  ;;  %v1709_v31 = vpop.eup %1708 }
 0x170   :  { %v628_v33 = vadd.f32 1.0, %v1709_v31  ;;  %v1463_v31 = vunpack.c.h.bf16 %v2066_v21 }
 0x171   :  { %1710 = vrcp.f32 %v621_v28  ;;  %v2078_v28 = vld [vmem:[%s2208_s2 + $0x28] sm:$0xff]  }
 0x172   :  { %1712 = vrcp.f32 %v628_v33  ;;  %v1470_v33 = vunpack.c.l.bf16 %v2078_v28 }
 0x17b   :  { %v1711_v35 = vpop.eup %1710 }
 0x17c   :  { %v631_v37 = vmul.f32 %v1711_v35, %v612_v34  ;;  %v1713_v41 = vpop.eup %1712 }
 0x17d   :  { %v634_v43 = vsub.f32 1.0, %v1713_v41  ;;  %v636_v45 = vmul.f32 %v1713_v41, %v1973_v49  ;;  %v1450_v49 = vunpack.c.l.bf16 %v2022_v50 }
 0x17e   :  { %v632_v38 = vadd.f32 %v631_v37, %v353_v36  ;;  %v2090_v36 = vld [vmem:[%s2208_s2 + $0x30] sm:$0xff]  }
 0x17f   :  { %v1474_v40 = vunpack.c.l.bf16 %v2090_v36 }
 0x180   :  { %1714 = vtanh.f32 %v632_v38  ;;  %v1471_v38 = vunpack.c.h.bf16 %v2078_v28 }
 0x18a   :  { %v1715_v44 = vpop.eup %1714 }
 0x18b   :  { %v635_v46 = vmul.f32 %v1715_v44, %v634_v43  ;;  %v2102_v43 = vld [vmem:[%s2208_s2 + $0x38] sm:$0xff]  }
 0x18d   :  { %v637_v48 = vadd.f32 %v636_v45, %v635_v46  ;;  %v1475_v45 = vunpack.c.h.bf16 %v2090_v36 }
 0x18f   :  { %v1149_v51 = vpack.c.bf16 %v637_v48, %v637_v48  ;;  %1368 = vst [vmem:[%s2216_s10] sm:$0xff] %v637_v48  ;;  %v684_v52 = vrot.slane %v637_v48, %v683_v47  ;;  %v677_v56 = vcombine.high %v637_v48, %v637_v48 }
 0x191   :  { %1600 = vmatmul.mubr.bf16.vlgmr.msra.gmra.mrb[8].mxu1 %v1149_v51  ;;  %v700_v54 = vrot.slane %v684_v52, %v683_v47  ;;  %v692_v55 = vcombine.high %v684_v52, %v684_v52  ;;  %v691_v1 = vrot.slane %v677_v56, %v683_v47  ;;  %v1479_v52 = vunpack.c.h.bf16 %v2102_v43 }
 0x192   :  { %v1830_v56 = vmov -1e+30  }
 0x193   :  { %v729_v57 = vrot.slane %v700_v54, %v1997_v5  ;;  %v714_v59 = vrot.slane %v692_v55, %v683_v47  ;;  %v722_v63 = vcombine.high %v700_v54, %v700_v54  ;;  %v707_v13 = vrot.slane %v691_v1, %v683_v47  ;;  %641 = vst.msk [vmem:[#allocation4] sm:$0xff] %vm640_vm1, %v1830_v56 }
 0x194   :  { %v693_v20 = vcombine.high %v691_v1, %v691_v1 }
 0x195   :  { %v766_v61 = vmul.f32 %v1450_v49, %v729_v57  ;;  %v733_v62 = vrot.slane %v714_v59, %v1997_v5  ;;  %v767_v9 = vmul.f32 %v1451_v60, %v729_v57  ;;  %v737_v11 = vrot.slane %v722_v63, %v1997_v5 }
 0x196   :  { %v745_v18 = vrot.slane %v707_v13, %v1997_v5  ;;  %v724_v19 = vcombine.high %v714_v59, %v714_v59  ;;  %v721_v27 = vrot.slane %v693_v20, %v683_v47  ;;  %v723_v35 = vcombine.high %v707_v13, %v707_v13 }
 0x197   :  { %782 = vadd.xlane.f32.xlu0 %v766_v61  ;;  %v768_v6 = vmul.f32 %v1454_v58, %v733_v62  ;;  %v769_v14 = vmul.f32 %v1455_v7, %v733_v62  ;;  %v770_v17 = vmul.f32 %v1458_v10, %v737_v11  ;;  %v771_v22 = vmul.f32 %v1459_v15, %v737_v11 }
 0x198   :  { %v774_v24 = vmul.f32 %v1466_v16, %v745_v18  ;;  %v741_v26 = vrot.slane %v724_v19, %v1997_v5  ;;  %v775_v30 = vmul.f32 %v1467_v23, %v745_v18  ;;  %v749_v34 = vrot.slane %v721_v27, %v1997_v5 }
 0x199   :  { %786 = vadd.xlane.f32.xlu1 %v768_v6  ;;  %v753_v41 = vrot.slane %v723_v35, %v1997_v5  ;;  %v725_v42 = vcombine.high %v721_v27, %v721_v27  ;;  %v1478_v47 = vunpack.c.l.bf16 %v2102_v43  ;;  %v816_v6 = vand.u32 127, %v134_v3 }
 0x19a   :  { %v772_v32 = vmul.f32 %v1462_v25, %v741_v26  ;;  %v773_v37 = vmul.f32 %v1463_v31, %v741_v26  ;;  %v776_v39 = vmul.f32 %v1470_v33, %v749_v34  ;;  %v777_v44 = vmul.f32 %v1471_v38, %v749_v34 }
 0x19b   :  { %784 = vadd.xlane.f32.xlu0 %v767_v9  ;;  %v778_v46 = vmul.f32 %v1474_v40, %v753_v41  ;;  %v757_v48 = vrot.slane %v725_v42, %v1997_v5  ;;  %v779_v51 = vmul.f32 %v1475_v45, %v753_v41  ;;  %v840_v11 = vadd.s32 4294967288, %v816_v6 }
 0x19c   :  { %v838_v19 = vsub.s32 %v816_v6, %v1994_v4  ;;  %vm819_vm10 = vcmp.lt.s32.totalorder %v816_v6, 8 }
 0x19d   :  { %788 = vadd.xlane.f32.xlu1 %v769_v14  ;;  %v780_v54 = vmul.f32 %v1478_v47, %v757_v48  ;;  %v781_v55 = vmul.f32 %v1479_v52, %v757_v48 }
 0x19f   :  { %790 = vadd.xlane.f32.xlu0 %v770_v17  ;;  %v843_v17 = vsub.s32 %v840_v11, %v1994_v4 }
 0x1a1   :  { %792 = vadd.xlane.f32.xlu1 %v771_v22 }
 0x1a3   :  { %798 = vadd.xlane.f32.xlu0 %v774_v24 }
 0x1a5   :  { %800 = vadd.xlane.f32.xlu1 %v775_v30 }
 0x1a7   :  { %794 = vadd.xlane.f32.xlu0 %v772_v32 }
 0x1a9   :  { %796 = vadd.xlane.f32.xlu1 %v773_v37 }
 0x1ab   :  { %802 = vadd.xlane.f32.xlu0 %v776_v39 }
 0x1ad   :  { %804 = vadd.xlane.f32.xlu1 %v777_v44 }
 0x1af   :  { %806 = vadd.xlane.f32.xlu0 %v778_v46 }
 0x1b1   :  { %808 = vadd.xlane.f32.xlu1 %v779_v51 }
 0x1b3   :  { %810 = vadd.xlane.f32.xlu0 %v780_v54 }
 0x1b5   :  { %812 = vadd.xlane.f32.xlu1 %v781_v55 }
 0x224   :  { %v783_v57 = vpop.xlane.xlu0 %782 }
 0x225   :  { %v839_v35 = vrot.slane %v783_v57, %v838_v19 }
 0x226   :  { %v787_v59 = vpop.xlane.xlu1 %786 }
 0x227   :  { %v850_v26 = vrot.slane %v787_v59, %v838_v19 }
 0x228   :  { %v785_v61 = vpop.xlane.xlu0 %784 }
 0x229   :  { %v844_v27 = vrot.slane %v785_v61, %v843_v17 }
 0x22a   :  { %v789_v62 = vpop.xlane.xlu1 %788 }
 0x22b   :  { %v854_v20 = vrot.slane %v789_v62, %v843_v17  ;;  %v846_v42 = vsel %vm845_vm2, %v844_v27, %v839_v35 }
 0x22c   :  { %v791_v63 = vpop.xlane.xlu0 %790 }
 0x22d   :  { %v859_v32 = vrot.slane %v791_v63, %v838_v19  ;;  %v855_v3 = vsel %vm845_vm2, %v854_v20, %v850_v26 }
 0x22e   :  { %v793_v1 = vpop.xlane.xlu1 %792  ;;  %v911_v48 = vsel %vm910_vm3, %v855_v3, %v846_v42  ;;  %v926_v3 = vld [vmem:[#allocation4] sm:$0xff] }
 0x22f   :  { %v863_v22 = vrot.slane %v793_v1, %v843_v17 }
 0x230   :  { %v799_v9 = vpop.xlane.xlu0 %798 }
 0x231   :  { %v864_v39 = vsel %vm845_vm2, %v863_v22, %v859_v32  ;;  %v877_v59 = vrot.slane %v799_v9, %v838_v19 }
 0x232   :  { %v801_v13 = vpop.xlane.xlu1 %800  ;;  %v913_v55 = vsel %vm912_vm4, %v864_v39, %v911_v48 }
 0x233   :  { %v881_v51 = vrot.slane %v801_v13, %v843_v17 }
 0x234   :  { %v795_v14 = vpop.xlane.xlu0 %794 }
 0x235   :  { %v868_v37 = vrot.slane %v795_v14, %v838_v19  ;;  %v882_v11 = vsel %vm845_vm2, %v881_v51, %v877_v59  ;;  %v1004_v59 = vsub.s32 4, %v1994_v4 }
 0x236   :  { %v797_v18 = vpop.xlane.xlu1 %796 }
 0x237   :  { %v872_v30 = vrot.slane %v797_v18, %v843_v17 }
 0x238   :  { %v803_v24 = vpop.xlane.xlu0 %802 }
 0x239   :  { %v873_v44 = vsel %vm845_vm2, %v872_v30, %v868_v37  ;;  %v886_v56 = vrot.slane %v803_v24, %v838_v19 }
 0x23a   :  { %v805_v34 = vpop.xlane.xlu1 %804  ;;  %v915_v61 = vsel %vm914_vm5, %v873_v44, %v913_v55 }
 0x23b   :  { %v890_v46 = vrot.slane %v805_v34, %v843_v17  ;;  %v917_v22 = vsel %vm916_vm6, %v882_v11, %v915_v61 }
 0x23c   :  { %v807_v41 = vpop.xlane.xlu0 %806 }
 0x23d   :  { %v895_v62 = vrot.slane %v807_v41, %v838_v19  ;;  %v891_v1 = vsel %vm845_vm2, %v890_v46, %v886_v56  ;;  %v993_v56 = vsub.s32 3, %v1994_v4 }
 0x23e   :  { %v809_v54 = vpop.xlane.xlu1 %808  ;;  %v919_v9 = vsel %vm918_vm7, %v891_v1, %v917_v22  ;;  %v943_v22 = vld [vmem:[#allocation5] sm:$0xff] }
 0x23f   :  { %v899_v57 = vrot.slane %v809_v54, %v843_v17 }
 0x240   :  { %v811_v63 = vpop.xlane.xlu0 %810 }
 0x241   :  { %v900_v14 = vsel %vm845_vm2, %v899_v57, %v895_v62  ;;  %v904_v13 = vrot.slane %v811_v63, %v838_v19  ;;  %v1015_v62 = vsub.s32 5, %v1994_v4  ;;  %v1026_v63 = vsub.s32 6, %v1994_v4 }
 0x242   :  { %v813_v18 = vpop.xlane.xlu1 %812  ;;  %v921_v26 = vsel %vm920_vm8, %v900_v14, %v919_v9 }
 0x243   :  { %v908_v20 = vrot.slane %v813_v18, %v843_v17  ;;  %v1698_v18 = vld [vmem:[#allocation11] sm:$0xff]  }
 0x244   :  { %1564 = vmatpush3.bf16.msra.mxu0 %v1698_v18 }
 0x245   :  { %v909_v24 = vsel %vm845_vm2, %v908_v20, %v904_v13  ;;  %v1699_v13 = vld [vmem:[#allocation11 + $0x8] sm:$0xff]   ;;  %1565 = vmatprep.subr.bf16.mxu0 %v1826_v0  ;;  %v1700_v20 = vld [vmem:[#allocation11 + $0x10] sm:$0xff]  }
 0x246   :  { %v923_v27 = vsel %vm922_vm9, %v909_v24, %v921_v26 }
 0x247   :  { %v925_v30 = vsel %vm819_vm10, %v923_v27, -1e+30 }
 0x248   :  { %v928_v32 = vsel %vm927_vm11, %v925_v30, -inf  ;;  %1566 = vmatpush3.bf16.msra.mxu0 %v1699_v13 }
 0x249   :  { %929 = vmax.xlane.f32.xlu0 %v928_v32  ;;  %1567 = vmatprep.subr.bf16.mxu0 %v1826_v0  ;;  %v1703_v32 = vld [vmem:[#allocation11 + $0x28] sm:$0xff]  }
 0x24c   :  { %1568 = vmatpush3.bf16.msra.mxu0 %v1700_v20 }
 0x24d   :  { %1569 = vmatprep.subr.bf16.mxu0 %v1826_v0 }
 0x264   :  { %v2140_v34 = vpop.f32.mrb[8].mxu1 }
 0x265   :  { %v1601_v17 = vpop.f32.mrb[9].mxu1 }
 0x266   :  { %v1356_v19 = vpop.f32.mrb[10].mxu1  ;;  %v1704_v17 = vld [vmem:[#allocation11 + $0x30] sm:$0xff]  }
 0x267   :  { %v1602_v35 = vpop.f32.mrb[11].mxu1  ;;  %v1705_v19 = vld [vmem:[#allocation11 + $0x38] sm:$0xff]  }
 0x2d6   :  { %v930_v6 = vpop.xlane.xlu0 %929 }
 0x2d7   :  { %v931_v37 = vmax.f32 %v926_v3, %v930_v6 }
 0x2d9   :  { %v932_v39 = vsub.f32 %v926_v3, %v931_v37  ;;  %1136 = vst.msk [vmem:[#allocation4] sm:$0xff] %vm640_vm1, %v931_v37  ;;  %937 = vperm.xlu1 %1624, %v931_v37  }
 0x2db   :  { %v933_v11 = vmul.f32 1.442695, %v932_v39 }
 0x358   :  { %v938_v41 = vpop.permute.xlu1 %937 }
 0x359   :  { %v940_v42 = vsub.f32 %v925_v30, %v938_v41  ;;  %v1702_v30 = vld [vmem:[#allocation11 + $0x20] sm:$0xff]  }
 0x35b   :  { %v941_v44 = vmul.f32 1.442695, %v940_v42 }
 0x35d   :  { %1716 = vpow2.f32 %v941_v44 }
 0x35e   :  { %1718 = vpow2.f32 %v933_v11 }
 0x367   :  { %v1717_v46 = vpop.eup %1716 }
 0x368   :  { %v945_v48 = vsel %vm927_vm11, %v1717_v46, 0.0  ;;  %v961_v51 = vrot.slane %v1717_v46, %v1997_v5  ;;  %v972_v54 = vrot.slane %v1717_v46, %v2006_v8  ;;  %v983_v55 = vrot.slane %v1717_v46, %v2013_v29  ;;  %v1719_v14 = vpop.eup %1718 }
 0x369   :  { %946 = vadd.xlane.f32.xlu0 %v945_v48  ;;  %v994_v57 = vrot.slane %v1717_v46, %v993_v56  ;;  %v1005_v61 = vrot.slane %v1717_v46, %v1004_v59  ;;  %v1016_v5 = vrot.slane %v1717_v46, %v1015_v62  ;;  %v1027_v8 = vrot.slane %v1717_v46, %v1026_v63 }
 0x36a   :  { %967 = vbcast.lane.b32.xlu1 %v961_v51, 264  ;;  %v1037_v29 = vsub.s32 7, %v1994_v4  ;;  %v1701_v4 = vld [vmem:[#allocation11 + $0x18] sm:$0xff]   ;;  %v944_v9 = vmul.f32 %v1719_v14, %v943_v22 }
 0x36b   :  { %1570 = vmatpush3.bf16.msra.mxu0 %v1701_v4 }
 0x36c   :  { %v1038_v1 = vrot.slane %v1717_v46, %v1037_v29  ;;  %1571 = vmatprep.subr.bf16.mxu0 %v1826_v0 }
 0x36e   :  { %974 = vbcast.lane.b32.xlu1 %v972_v54, 256 }
 0x36f   :  { %1572 = vmatpush3.bf16.msra.mxu0 %v1702_v30 }
 0x370   :  { %1573 = vmatprep.subr.bf16.mxu0 %v1826_v0 }
 0x372   :  { %978 = vbcast.lane.b32.xlu1 %v972_v54, 264 }
 0x373   :  { %1574 = vmatpush3.bf16.msra.mxu0 %v1703_v32 }
 0x374   :  { %1575 = vmatprep.subr.bf16.mxu0 %v1826_v0 }
 0x376   :  { %985 = vbcast.lane.b32.xlu1 %v983_v55, 256 }
 0x377   :  { %1576 = vmatpush3.bf16.msra.mxu0 %v1704_v17 }
 0x378   :  { %1577 = vmatprep.subr.bf16.mxu0 %v1826_v0 }
 0x37a   :  { %996 = vbcast.lane.b32.xlu1 %v994_v57, 256 }
 0x37b   :  { %1578 = vmatpush3.bf16.msra.mxu0 %v1705_v19 }
 0x37e   :  { %1007 = vbcast.lane.b32.xlu1 %v1005_v61, 256 }
 0x37f   :  { %963 = vbcast.lane.b32.xlu0 %v961_v51, 256 }
 0x382   :  { %1018 = vbcast.lane.b32.xlu1 %v1016_v5, 256 }
 0x383   :  { %989 = vbcast.lane.b32.xlu0 %v983_v55, 264 }
 0x386   :  { %1029 = vbcast.lane.b32.xlu1 %v1027_v8, 256 }
 0x387   :  { %1000 = vbcast.lane.b32.xlu0 %v994_v57, 264 }
 0x38a   :  { %1040 = vbcast.lane.b32.xlu1 %v1038_v1, 256 }
 0x38b   :  { %1011 = vbcast.lane.b32.xlu0 %v1005_v61, 264 }
 0x38f   :  { %1022 = vbcast.lane.b32.xlu0 %v1016_v5, 264 }
 0x393   :  { %1033 = vbcast.lane.b32.xlu0 %v1027_v8, 264 }
 0x397   :  { %1044 = vbcast.lane.b32.xlu0 %v1038_v1, 264 }
 0x39b   :  { %954 = vperm.xlu0 %1625, %v1719_v14  }
 0x3dc   :  { %v968_v35 = vpop.permute.xlu1 %967 }
 0x3dd   :  { %v1047_v59 = vmul.f32 %v1451_v60, %v968_v35 }
 0x3e0   :  { %v975_v3 = vpop.permute.xlu1 %974 }
 0x3e4   :  { %v979_v37 = vpop.permute.xlu1 %978 }
 0x3e5   :  { %v1049_v61 = vmul.f32 %v1455_v7, %v979_v37 }
 0x3e8   :  { %v986_v41 = vpop.permute.xlu1 %985 }
 0x3e9   :  { %v1050_v5 = vmul.f32 %v1458_v10, %v986_v41 }
 0x3ec   :  { %v997_v44 = vpop.permute.xlu1 %996 }
 0x3ed   :  { %v1052_v50 = vmul.f32 %v1462_v25, %v997_v44 }
 0x3f0   :  { %v1008_v48 = vpop.permute.xlu1 %1007 }
 0x3f4   :  { %v1019_v54 = vpop.permute.xlu1 %1018 }
 0x3f5   :  { %v1056_v53 = vmul.f32 %v1470_v33, %v1019_v54 }
 0x3f6   :  { %v947_v24 = vpop.xlane.xlu0 %946 }
 0x3f7   :  { %v948_v26 = vadd.f32 %v947_v24, %v944_v9 }
 0x3f8   :  { %v1030_v56 = vpop.permute.xlu1 %1029 }
 0x3f9   :  { %950 = vst.msk [vmem:[#allocation5] sm:$0xff] %vm640_vm1, %v948_v26  ;;  %v1058_v25 = vmul.f32 %v1474_v40, %v1030_v56 }
 0x3fa   :  { %v964_v6 = vpop.permute.xlu0 %963 }
 0x3fb   :  { %v1046_v57 = vmul.f32 %v1450_v49, %v964_v6  ;;  %v1048_v49 = vmul.f32 %v1454_v58, %v975_v3 }
 0x3fd   :  { %v1062_v60 = vadd.f32 %v1047_v59, %v1046_v57 }
 0x3fe   :  { %v990_v39 = vpop.permute.xlu0 %989 }
 0x3ff   :  { %v1051_v0 = vmul.f32 %v1459_v15, %v990_v39  ;;  %v1054_v15 = vmul.f32 %v1466_v16, %v1008_v48  ;;  %v1063_v29 = vrot.slane %v1062_v60, 4 }
 0x400   :  { %v1141_v27 = vld [vmem:[#allocation5] sm:$0xff] }
 0x401   :  { %1144 = vperm.xlu1 %1624, %v1141_v27   ;;  %v1076_v2 = vadd.f32 %v1051_v0, %v1050_v5  ;;  %v1064_v33 = vadd.f32 %v1063_v29, %v1062_v60 }
 0x402   :  { %v1001_v42 = vpop.permute.xlu0 %1000 }
 0x403   :  { %v1053_v62 = vmul.f32 %v1463_v31, %v1001_v42  ;;  %v1041_v31 = vpop.permute.xlu1 %1040  ;;  %v1077_v1 = vrot.slane %v1076_v2, 4  ;;  %v1065_v9 = vrot.slane %v1064_v33, 2 }
 0x404   :  { %v1060_v12 = vmul.f32 %v1478_v47, %v1041_v31 }
 0x405   :  { %v1083_v58 = vadd.f32 %v1053_v62, %v1052_v50  ;;  %v1078_v20 = vadd.f32 %v1077_v1, %v1076_v2  ;;  %v1066_v17 = vadd.f32 %v1065_v9, %v1064_v33 }
 0x406   :  { %v1012_v46 = vpop.permute.xlu0 %1011 }
 0x407   :  { %v1055_v63 = vmul.f32 %v1467_v23, %v1012_v46  ;;  %v1069_v23 = vadd.f32 %v1049_v61, %v1048_v49  ;;  %v1084_v14 = vrot.slane %v1083_v58, 4  ;;  %v1079_v26 = vrot.slane %v1078_v20, 2 }
 0x408   :  { %v1067_v42 = vrot.slane %v1066_v17, 1 }
 0x409   :  { %v1085_v22 = vadd.f32 %v1084_v14, %v1083_v58  ;;  %v1080_v35 = vadd.f32 %v1079_v26, %v1078_v20 }
 0x40a   :  { %v1023_v51 = vpop.permute.xlu0 %1022  ;;  %v1068_v57 = vadd.f32 %v1067_v42, %v1066_v17 }
 0x40b   :  { %v1057_v7 = vmul.f32 %v1471_v38, %v1023_v51  ;;  %v1090_v38 = vadd.f32 %v1055_v63, %v1054_v15  ;;  %v1086_v27 = vrot.slane %v1085_v22, 2  ;;  %v1081_v46 = vrot.slane %v1080_v35, 1 }
 0x40d   :  { %v1097_v16 = vadd.f32 %v1057_v7, %v1056_v53  ;;  %v1091_v28 = vrot.slane %v1090_v38, 4  ;;  %v1087_v37 = vadd.f32 %v1086_v27, %v1085_v22  ;;  %v1082_v59 = vadd.f32 %v1081_v46, %v1080_v35 }
 0x40e   :  { %v1034_v55 = vpop.permute.xlu0 %1033 }
 0x40f   :  { %v1059_v10 = vmul.f32 %v1475_v45, %v1034_v55  ;;  %v1070_v45 = vrot.slane %v1069_v23, 4  ;;  %v1098_v13 = vrot.slane %v1097_v16, 4  ;;  %v1092_v40 = vadd.f32 %v1091_v28, %v1090_v38 }
 0x410   :  { %v1088_v54 = vrot.slane %v1087_v37, 1 }
 0x411   :  { %v1104_v11 = vadd.f32 %v1059_v10, %v1058_v25  ;;  %v1099_v24 = vadd.f32 %v1098_v13, %v1097_v16  ;;  %v1093_v32 = vrot.slane %v1092_v40, 2 }
 0x412   :  { %v1045_v8 = vpop.permute.xlu0 %1044  ;;  %v1089_v5 = vadd.f32 %v1088_v54, %v1087_v37 }
 0x413   :  { %v1061_v21 = vmul.f32 %v1479_v52, %v1045_v8  ;;  %v1105_v4 = vrot.slane %v1104_v11, 4  ;;  %v1071_v52 = vadd.f32 %v1070_v45, %v1069_v23  ;;  %v1100_v19 = vrot.slane %v1099_v24, 2 }
 0x414   :  { %v1094_v41 = vadd.f32 %v1093_v32, %v1092_v40 }
 0x415   :  { %v1111_v18 = vadd.f32 %v1061_v21, %v1060_v12  ;;  %v1106_v43 = vadd.f32 %v1105_v4, %v1104_v11  ;;  %v1072_v47 = vrot.slane %v1071_v52, 2  ;;  %v1101_v44 = vadd.f32 %v1100_v19, %v1099_v24  ;;  %v1447_v11 = vld [vmem:[%s2215_s9] ss:$0 sm:$0xff] }
 0x416   :  { %v1095_v56 = vrot.slane %v1094_v41, 1 }
 0x417   :  { %v1112_v36 = vrot.slane %v1111_v18, 4  ;;  %v1107_v3 = vrot.slane %v1106_v43, 2  ;;  %v1073_v6 = vadd.f32 %v1072_v47, %v1071_v52  ;;  %v1102_v0 = vrot.slane %v1101_v44, 1 }
 0x418   :  { %v1096_v8 = vadd.f32 %v1095_v56, %v1094_v41 }
 0x419   :  { %v1113_v30 = vadd.f32 %v1112_v36, %v1111_v18  ;;  %v1108_v48 = vadd.f32 %v1107_v3, %v1106_v43  ;;  %v1074_v51 = vrot.slane %v1073_v6, 1  ;;  %v1103_v60 = vadd.f32 %v1102_v0, %v1101_v44 }
 0x41a   :  { %v955_v53 = vpop.permute.xlu0 %954 }
 0x41b   :  { %v1114_v39 = vrot.slane %v1113_v30, 2  ;;  %v1109_v61 = vrot.slane %v1108_v48, 1  ;;  %v1075_v62 = vadd.f32 %v1074_v51, %v1073_v6  ;;  %v957_v25 = vmul.f32 0.0, %v955_v53 }
 0x41d   :  { %v1115_v55 = vadd.f32 %v1114_v39, %v1113_v30  ;;  %v1126_v50 = vsel %vm910_vm3, %v1075_v62, %v1068_v57  ;;  %v1110_v15 = vadd.f32 %v1109_v61, %v1108_v48 }
 0x41e   :  { %v1127_v7 = vsel %vm912_vm4, %v1082_v59, %v1126_v50 }
 0x41f   :  { %v1116_v63 = vrot.slane %v1115_v55, 1  ;;  %v1128_v2 = vsel %vm914_vm5, %v1089_v5, %v1127_v7 }
 0x420   :  { %v1129_v10 = vsel %vm916_vm6, %v1096_v8, %v1128_v2 }
 0x421   :  { %v1117_v31 = vadd.f32 %v1116_v63, %v1115_v55  ;;  %v1130_v23 = vsel %vm918_vm7, %v1103_v60, %v1129_v10 }
 0x422   :  { %v1131_v58 = vsel %vm920_vm8, %v1110_v15, %v1130_v23 }
 0x423   :  { %v1132_v21 = vsel %vm922_vm9, %v1117_v31, %v1131_v58 }
 0x424   :  { %v1134_v38 = vadd.f32 %v1132_v21, %v957_v25 }
 0x480   :  { %v1145_v49 = vpop.permute.xlu1 %1144 }
 0x481   :  { %1720 = vrcp.f32 %v1145_v49 }
 0x48b   :  { %v1721_v29 = vpop.eup %1720 }
 0x48c   :  { %v1148_v12 = vmul.f32 %v1721_v29, %v1134_v38 }
 0x48e   :  { %v1166_v16 = vpack.c.bf16 %v1148_v12, %v1148_v12 }
 0x490   :  { %1580 = vmatmul.mubr.bf16.vlgmr.msra.gmra.mrb[4].mxu0 %v1166_v16 }
 0x563   :  { %v1265_v1 = vpop.f32.mrb[4].mxu0 }
 0x564   :  { %v1354_v45 = vadd.f32 %v2140_v34, %v1265_v1  ;;  %v1581_v14 = vpop.f32.mrb[5].mxu0 }
 0x565   :  { %v1268_v18 = vpop.f32.mrb[6].mxu0 }
 0x566   :  { %v1366_v28 = vadd.f32 %v1447_v11, %v1354_v45  ;;  %v1582_v33 = vpop.f32.mrb[7].mxu0 }
 0x568   :  { %1722 = vtanh.f32 %v1366_v28 }
 0x572   :  { %v1723_v13 = vpop.eup %1722 }
 0x573   :  { %1369 = vst [vmem:[%s2217_s11] sm:$0xff] %v1723_v13 }
 0x574   :  { %1378 = vsyncpa [#allocation7], 1 }
 0x575   :  { %1379 = vsyncpa [#allocation9], 1 }
 0x576   :  { %1380 = vsyncpa [#allocation12], 1 }

</bundles_post_ra>
